<compile_context>
chip_gen: v7x
topology: tpu7x:2x2x1
jax: 0.10.0
libtpu: 0.0.40
codegen_flags: <defaults>
</compile_context>

<pallas_src>
import functools
import math

import jax
import jax.numpy as jnp
from jax.experimental import pallas as pl
from jax.experimental.pallas import tpu as pltpu


# ----------------------------- Pallas kernel ------------------------------


def _full_spec(shape):
    nd = len(shape)
    return pl.BlockSpec(shape, lambda *_: (0,) * nd)


# Row indices inside the packed bias / LayerNorm slab (see prepare_decoder_layer_params).
_SA_QB, _SA_KB, _SA_VB, _SA_OB, _SA_LNG, _SA_LNB = 0, 1, 2, 3, 4, 5
_EA_QB, _EA_KB, _EA_VB, _EA_OB, _EA_LNG, _EA_LNB = 6, 7, 8, 9, 10, 11
_FC1_B, _FC2_B, _FL_LNG, _FL_LNB = 12, 13, 14, 15
_NUM_VEC_ROWS = 16


def _decoder_layer_kernel(
    x_ref, enc_ref,
    sa_w_ref, ea_wqo_ref, ea_wkv_ref, fc1_w_ref, fc2_w_ref, vec_ref,
    out_ref, attn_ref,
    *, num_heads, batch, scale, eps,
):
    f32 = jnp.float32

    x = x_ref[...]          # (B*T, E), batch-major rows (row n = b*T + t)
    enc = enc_ref[...]      # (B*S, Ek), batch-major rows
    vecs = vec_ref[...]     # (16, max(E, FFN)) packed biases / LN params

    n_q, e = x.shape
    b = batch
    h = num_heads
    dh = e // h
    ffn = fc1_w_ref.shape[1]
    inv_scale = 1.0 / scale

    def vec(i, n=e):
        return vecs[i:i + 1, :n]          # (1, n) row of the packed slab

    def layer_norm(y, g_i, b_i):
        # two-pass (x - mean) variance: robust, matches torch.nn.LayerNorm
        mean = jnp.mean(y, axis=-1, keepdims=True)
        cent = y - mean
        var = jnp.mean(cent * cent, axis=-1, keepdims=True)
        return cent * jax.lax.rsqrt(var + eps) * vec(g_i) + vec(b_i)

    def mha(q2, k2, v2, wo, o_b_i):
        # q2: (B*Tq, E); k2/v2: (B*Sk, E)  (batch-major rows, head-major columns)
        nq = q2.shape[0]
        tq = nq // b
        sk = k2.shape[0] // b
        q2 = q2 * inv_scale
        att_cols = []
        for hh in range(h):                      # static unrolled loop over heads
            cs = hh * dh
            qh = q2[:, cs:cs + dh].reshape(b, tq, dh)
            kh = k2[:, cs:cs + dh].reshape(b, sk, dh)
            vh = v2[:, cs:cs + dh].reshape(b, sk, dh)
            sc = jnp.einsum("btd,bsd->bts", qh, kh,
                            preferred_element_type=f32)          # (B, Tq, Sk)
            m = jnp.max(sc, axis=-1, keepdims=True)
            p = jnp.exp(sc - m)
            denom = jnp.sum(p, axis=-1, keepdims=True)
            alpha = p * pl.reciprocal(denom, approx=False)
            ah = jnp.einsum("bts,bsd->btd", alpha, vh,
                            preferred_element_type=f32)          # (B, Tq, Dh)
            att_cols.append(ah.reshape(nq, dh))
        att = jnp.concatenate(att_cols, axis=-1)                 # (B*Tq, H*Dh) lane-dense
        out = jnp.dot(att, wo, preferred_element_type=f32) + vec(o_b_i)
        return out, att

    # --- self attention block (fused [Wq|Wk|Wv|Wo] weight slab) ---
    sa_w = sa_w_ref[...]                                         # (E, 4E)
    qkv = jnp.dot(x, sa_w[:, :3 * e], preferred_element_type=f32)
    q = qkv[:, 0:e] + vec(_SA_QB)
    k = qkv[:, e:2 * e] + vec(_SA_KB)
    v = qkv[:, 2 * e:3 * e] + vec(_SA_VB)
    sa_out, _ = mha(q, k, v, sa_w[:, 3 * e:], _SA_OB)
    state1 = layer_norm(sa_out + x, _SA_LNG, _SA_LNB)

    # --- encoder-decoder attention block (fused [Wq|Wo] and [Wk|Wv] slabs) ---
    ea_wqo = ea_wqo_ref[...]                                     # (E, 2E)
    ea_wkv = ea_wkv_ref[...]                                     # (Ek, 2E)
    q_e = jnp.dot(state1, ea_wqo[:, :e], preferred_element_type=f32) + vec(_EA_QB)
    kv_e = jnp.dot(enc, ea_wkv, preferred_element_type=f32)
    k_e = kv_e[:, 0:e] + vec(_EA_KB)
    v_e = kv_e[:, e:2 * e] + vec(_EA_VB)
    ea_out, att = mha(q_e, k_e, v_e, ea_wqo[:, e:], _EA_OB)
    state2 = layer_norm(ea_out + state1, _EA_LNG, _EA_LNB)

    # --- feed-forward block ---
    hidden = jnp.dot(state2, fc1_w_ref[...],
                     preferred_element_type=f32) + vec(_FC1_B, ffn)
    hidden = jnp.maximum(hidden, 0.0)
    y = jnp.dot(hidden, fc2_w_ref[...],
                preferred_element_type=f32) + vec(_FC2_B)
    state3 = layer_norm(y + state2, _FL_LNG, _FL_LNB)

    out_ref[...] = state3.astype(out_ref.dtype)
    attn_ref[...] = att.astype(attn_ref.dtype)                   # lane-dense (B*T, H*Dh)


# ----------------------------- wrappers (glue) ------------------------------


def prepare_decoder_layer_params(params):
    """One-time re-layout of torch-convention params into packed kernel slabs.

    All weight transposes / concatenations and the bias/LayerNorm vector packing happen
    here, once, outside the hot path (6 kernel parameter inputs instead of 22)."""
    sa = params["self_attn"]
    ea = params["enc_attn"]
    e = params["self_ln_g"].shape[0]
    ffn = params["fc1_b"].shape[0]
    width = max(e, ffn)

    def pad_row(v):
        return jnp.pad(v, (0, width - v.shape[0]))[None, :]

    vec_rows = [
        sa["q_b"], sa["k_b"], sa["v_b"], sa["o_b"],
        params["self_ln_g"], params["self_ln_b"],
        ea["q_b"], ea["k_b"], ea["v_b"], ea["o_b"],
        params["enc_ln_g"], params["enc_ln_b"],
        params["fc1_b"], params["fc2_b"],
        params["final_ln_g"], params["final_ln_b"],
    ]
    assert len(vec_rows) == _NUM_VEC_ROWS

    return {
        # [Wq^T | Wk^T | Wv^T | Wo^T] : (E, 4E)  (out-proj input is H*Dh = E, head-major)
        "sa_w": jnp.concatenate([sa["q_w"].T, sa["k_w"].T, sa["v_w"].T, sa["o_w"].T], axis=1),
        # [Wq^T | Wo^T] : (E, 2E)
        "ea_wqo": jnp.concatenate([ea["q_w"].T, ea["o_w"].T], axis=1),
        # [Wk^T | Wv^T] : (Ek, 2E)
        "ea_wkv": jnp.concatenate([ea["k_w"].T, ea["v_w"].T], axis=1),
        "fc1_w": params["fc1_w"].T,          # (E, FFN)
        "fc2_w": params["fc2_w"].T,          # (FFN, E)
        "vecs": jnp.concatenate([pad_row(v) for v in vec_rows], axis=0),   # (16, width)
    }


def transformer_decoder_layer(state, encoder_out, prep, num_heads, eps=1e-5):
    """state: (T, B, E); encoder_out: (S, B, Ek); prep: output of prepare_decoder_layer_params."""
    t, b, e = state.shape
    s, _, ek = encoder_out.shape
    dh = e // num_heads
    n_q = t * b
    n_k = s * b

    # batch-major flattening (row n = b*T + t) so per-batch attention is a leading-dim split
    x = state.transpose(1, 0, 2).reshape(n_q, e)
    enc = encoder_out.transpose(1, 0, 2).reshape(n_k, ek)

    args = (x, enc, prep["sa_w"], prep["ea_wqo"], prep["ea_wkv"],
            prep["fc1_w"], prep["fc2_w"], prep["vecs"])

    kernel = functools.partial(
        _decoder_layer_kernel,
        num_heads=num_heads, batch=b, scale=math.sqrt(dh), eps=eps)

    out, att = pl.pallas_call(
        kernel,
        grid=(1,),
        in_specs=[_full_spec(a.shape) for a in args],
        out_specs=(_full_spec((n_q, e)), _full_spec((n_q, e))),
        out_shape=(
            jax.ShapeDtypeStruct((n_q, e), state.dtype),
            jax.ShapeDtypeStruct((n_q, e), state.dtype),
        ),
        compiler_params=pltpu.CompilerParams(dimension_semantics=("arbitrary",)),
    )(*args)

    out = out.reshape(b, t, e).transpose(1, 0, 2)                       # (T, B, E)
    # kernel returns lane-dense (B*T, H*Dh); reference attn layout is (H, B, T, Dh)
    attn = att.reshape(b, t, num_heads, dh).transpose(2, 0, 1, 3)
    return out, attn


# -------------------------- deterministic init --------------------------


def xavier_uniform(key, shape, gain=1.0):
    fan_out, fan_in = shape
    limit = gain * math.sqrt(6.0 / (fan_in + fan_out))
    return jax.random.uniform(key, shape, jnp.float32, -limit, limit)


def linear_default_bias(key, fan_in, out_f):
    bound = 1.0 / math.sqrt(fan_in)
    return jax.random.uniform(key, (out_f,), jnp.float32, -bound, bound)


def make_mha_params(key, embed_dim, kdim):
    ks = jax.random.split(key, 8)
    g = 1.0 / math.sqrt(2.0)
    return {
        "k_w": xavier_uniform(ks[0], (embed_dim, kdim), gain=g),
        "k_b": linear_default_bias(ks[1], kdim, embed_dim),
        "v_w": xavier_uniform(ks[2], (embed_dim, kdim), gain=g),
        "v_b": linear_default_bias(ks[3], kdim, embed_dim),
        "q_w": xavier_uniform(ks[4], (embed_dim, kdim), gain=g),
        "q_b": linear_default_bias(ks[5], kdim, embed_dim),
        "o_w": xavier_uniform(ks[6], (embed_dim, embed_dim)),
        "o_b": jnp.zeros((embed_dim,), jnp.float32),
    }


def make_layer_params(key, embed_dim, ffn_dim, enc_embed_dim):
    ks = jax.random.split(key, 4)
    return {
        "self_attn": make_mha_params(ks[0], embed_dim, embed_dim),
        "enc_attn": make_mha_params(ks[1], embed_dim, enc_embed_dim),
        "self_ln_g": jnp.ones((embed_dim,), jnp.float32),
        "self_ln_b": jnp.zeros((embed_dim,), jnp.float32),
        "enc_ln_g": jnp.ones((embed_dim,), jnp.float32),
        "enc_ln_b": jnp.zeros((embed_dim,), jnp.float32),
        "fc1_w": xavier_uniform(ks[2], (ffn_dim, embed_dim)),
        "fc1_b": jnp.zeros((ffn_dim,), jnp.float32),
        "fc2_w": xavier_uniform(ks[3], (embed_dim, ffn_dim)),
        "fc2_b": jnp.zeros((embed_dim,), jnp.float32),
        "final_ln_g": jnp.ones((embed_dim,), jnp.float32),
        "final_ln_b": jnp.zeros((embed_dim,), jnp.float32),
    }


# ----------------------------- reference (plain JAX) -----------------------------


def _ref_layer(state, encoder_out, params, num_heads, eps=1e-5):
    def ln(x, g, b):
        m = x.mean(-1, keepdims=True)
        v = ((x - m) ** 2).mean(-1, keepdims=True)
        return (x - m) / jnp.sqrt(v + eps) * g + b

    def mha(q_in, kv_in, p):
        t, b, e = q_in.shape
        s = kv_in.shape[0]
        dh = e // num_heads
        q = q_in @ p["q_w"].T + p["q_b"]
        k = kv_in @ p["k_w"].T + p["k_b"]
        v = kv_in @ p["v_w"].T + p["v_b"]
        qh = q.reshape(t, b, num_heads, dh).transpose(1, 2, 0, 3)
        kh = k.reshape(s, b, num_heads, dh).transpose(1, 2, 0, 3)
        vh = v.reshape(s, b, num_heads, dh).transpose(1, 2, 0, 3)
        sc = qh @ kh.transpose(0, 1, 3, 2) / math.sqrt(dh)
        a = jax.nn.softmax(sc, axis=-1)
        att = a @ vh
        out = att.transpose(2, 0, 1, 3).reshape(t, b, e) @ p["o_w"].T + p["o_b"]
        return out, att.transpose(1, 0, 2, 3)

    x, _ = mha(state, state, params["self_attn"])
    state = ln(x + state, params["self_ln_g"], params["self_ln_b"])
    x, attn = mha(state, encoder_out, params["enc_attn"])
    state = ln(x + state, params["enc_ln_g"], params["enc_ln_b"])
    h = jax.nn.relu(state @ params["fc1_w"].T + params["fc1_b"])
    h = h @ params["fc2_w"].T + params["fc2_b"]
    state = ln(h + state, params["final_ln_g"], params["final_ln_b"])
    return state, attn


# ----------------------------------- main -----------------------------------

if __name__ == "__main__":
    # args: decoder_embed_dim=32, decoder_attention_heads=4,
    #       encoder_embed_dim=32, decoder_ffn_embed_dim=64,
    #       attention_dropout=0.0, activation_dropout=0.0
    T, B, E, H, FFN, S = 8, 2, 32, 4, 64, 8

    key = jax.random.PRNGKey(0)
    k_state, k_enc, k_params = jax.random.split(key, 3)

    state = jax.random.normal(k_state, (T, B, E), jnp.float32)
    encoder_out = jax.random.normal(k_enc, (S, B, E), jnp.float32)
    params = make_layer_params(k_params, E, FFN, E)

    prep = prepare_decoder_layer_params(params)   # one-time weight packing / re-layout

    out, attn = transformer_decoder_layer(state, encoder_out, prep, H)
    out = jax.block_until_ready(out)
    attn = jax.block_until_ready(attn)

    ref_out, ref_attn = _ref_layer(state, encoder_out, params, H)
    assert out.shape == (T, B, E) and attn.shape == (H, B, T, E // H)
    assert jnp.allclose(out, ref_out, atol=1e-4, rtol=1e-4)
    assert jnp.allclose(attn, ref_attn, atol=1e-4, rtol=1e-4)

    print("KERNEL_OK")
</pallas_src>

<mosaic_0001>
module attributes {stable_mosaic.version = 11 : i64} {
  func.func @_decoder_layer_kernel(%arg0: i32, %arg1: memref<16x32xf32, #tpu.memory_space<vmem>>, %arg2: memref<16x32xf32, #tpu.memory_space<vmem>>, %arg3: memref<32x128xf32, #tpu.memory_space<vmem>>, %arg4: memref<32x64xf32, #tpu.memory_space<vmem>>, %arg5: memref<32x64xf32, #tpu.memory_space<vmem>>, %arg6: memref<32x64xf32, #tpu.memory_space<vmem>>, %arg7: memref<64x32xf32, #tpu.memory_space<vmem>>, %arg8: memref<16x64xf32, #tpu.memory_space<vmem>>, %arg9: memref<16x32xf32, #tpu.memory_space<vmem>>, %arg10: memref<16x32xf32, #tpu.memory_space<vmem>>) attributes {dimension_semantics = [#tpu.dimension_semantics<arbitrary>], iteration_bounds = array<i64: 1>, scalar_prefetch = 0 : i64, scratch_operands = 0 : i64, tpu.core_type = #tpu.core_type<tc>, window_params = [{pipeline_mode = #tpu.pipeline_mode<synchronous>, transform_indices = @transform_0, window_bounds = array<i64: 16, 32>}, {pipeline_mode = #tpu.pipeline_mode<synchronous>, transform_indices = @transform_1, window_bounds = array<i64: 16, 32>}, {pipeline_mode = #tpu.pipeline_mode<synchronous>, transform_indices = @transform_2, window_bounds = array<i64: 32, 128>}, {pipeline_mode = #tpu.pipeline_mode<synchronous>, transform_indices = @transform_3, window_bounds = array<i64: 32, 64>}, {pipeline_mode = #tpu.pipeline_mode<synchronous>, transform_indices = @transform_4, window_bounds = array<i64: 32, 64>}, {pipeline_mode = #tpu.pipeline_mode<synchronous>, transform_indices = @transform_5, window_bounds = array<i64: 32, 64>}, {pipeline_mode = #tpu.pipeline_mode<synchronous>, transform_indices = @transform_6, window_bounds = array<i64: 64, 32>}, {pipeline_mode = #tpu.pipeline_mode<synchronous>, transform_indices = @transform_7, window_bounds = array<i64: 16, 64>}, {pipeline_mode = #tpu.pipeline_mode<synchronous>, transform_indices = @transform_8, window_bounds = array<i64: 16, 32>}, {pipeline_mode = #tpu.pipeline_mode<synchronous>, transform_indices = @transform_9, window_bounds = array<i64: 16, 32>}]} {
    %c0 = arith.constant 0 : index
    %c0_0 = arith.constant 0 : index
    %0 = vector.load %arg1[%c0, %c0_0] : memref<16x32xf32, #tpu.memory_space<vmem>>, vector<16x32xf32>
    %c0_1 = arith.constant 0 : index
    %c0_2 = arith.constant 0 : index
    %1 = vector.load %arg2[%c0_1, %c0_2] : memref<16x32xf32, #tpu.memory_space<vmem>>, vector<16x32xf32>
    %c0_3 = arith.constant 0 : index
    %c0_4 = arith.constant 0 : index
    %2 = vector.load %arg8[%c0_3, %c0_4] : memref<16x64xf32, #tpu.memory_space<vmem>>, vector<16x64xf32>
    %c0_5 = arith.constant 0 : index
    %c0_6 = arith.constant 0 : index
    %3 = vector.load %arg3[%c0_5, %c0_6] : memref<32x128xf32, #tpu.memory_space<vmem>>, vector<32x128xf32>
    %4 = vector.extract_strided_slice %3 {offsets = [0, 0], sizes = [32, 96], strides = [1, 1]} : vector<32x128xf32> to vector<32x96xf32>
    %cst = arith.constant dense<0.000000e+00> : vector<16x96xf32>
    %5 = tpu.matmul %0, %4, %cst {dimension_numbers = #tpu.dot_dimension_numbers<[1], [0], [0], [1], [0, 0, 1, 1], [], []>} : vector<16x32xf32>, vector<32x96xf32>, vector<16x96xf32> -> vector<16x96xf32>
    %6 = vector.extract_strided_slice %5 {offsets = [0, 0], sizes = [16, 32], strides = [1, 1]} : vector<16x96xf32> to vector<16x32xf32>
    %7 = vector.extract_strided_slice %2 {offsets = [0, 0], sizes = [1, 32], strides = [1, 1]} : vector<16x64xf32> to vector<1x32xf32>
    %8 = vector.broadcast %7 : vector<1x32xf32> to vector<16x32xf32>
    %9 = arith.addf %6, %8 : vector<16x32xf32>
    %10 = vector.extract_strided_slice %5 {offsets = [0, 32], sizes = [16, 32], strides = [1, 1]} : vector<16x96xf32> to vector<16x32xf32>
    %11 = vector.extract_strided_slice %2 {offsets = [1, 0], sizes = [1, 32], strides = [1, 1]} : vector<16x64xf32> to vector<1x32xf32>
    %12 = vector.broadcast %11 : vector<1x32xf32> to vector<16x32xf32>
    %13 = arith.addf %10, %12 : vector<16x32xf32>
    %14 = vector.extract_strided_slice %5 {offsets = [0, 64], sizes = [16, 32], strides = [1, 1]} : vector<16x96xf32> to vector<16x32xf32>
    %15 = vector.extract_strided_slice %2 {offsets = [2, 0], sizes = [1, 32], strides = [1, 1]} : vector<16x64xf32> to vector<1x32xf32>
    %16 = vector.broadcast %15 : vector<1x32xf32> to vector<16x32xf32>
    %17 = arith.addf %14, %16 : vector<16x32xf32>
    %18 = vector.extract_strided_slice %3 {offsets = [0, 96], sizes = [32, 32], strides = [1, 1]} : vector<32x128xf32> to vector<32x32xf32>
    %cst_7 = arith.constant 0.353553385 : f32
    %19 = vector.broadcast %cst_7 : f32 to vector<16x32xf32>
    %20 = arith.mulf %9, %19 : vector<16x32xf32>
    %21 = vector.extract_strided_slice %20 {offsets = [0, 0], sizes = [16, 8], strides = [1, 1]} : vector<16x32xf32> to vector<16x8xf32>
    %22 = vector.shape_cast %21 : vector<16x8xf32> to vector<2x8x8xf32>
    %23 = vector.extract_strided_slice %13 {offsets = [0, 0], sizes = [16, 8], strides = [1, 1]} : vector<16x32xf32> to vector<16x8xf32>
    %24 = vector.shape_cast %23 : vector<16x8xf32> to vector<2x8x8xf32>
    %25 = vector.extract_strided_slice %17 {offsets = [0, 0], sizes = [16, 8], strides = [1, 1]} : vector<16x32xf32> to vector<16x8xf32>
    %26 = vector.shape_cast %25 : vector<16x8xf32> to vector<2x8x8xf32>
    "tpu.trace_start"() <{level = 10 : i32, message = "btd,bsd->bts"}> : () -> ()
    %cst_8 = arith.constant dense<0.000000e+00> : vector<2x8x8xf32>
    %27 = tpu.matmul %22, %24, %cst_8 {dimension_numbers = #tpu.dot_dimension_numbers<[2], [2], [1], [1], [0, 0, 0, 1, 1, 1], [0], [0]>} : vector<2x8x8xf32>, vector<2x8x8xf32>, vector<2x8x8xf32> -> vector<2x8x8xf32>
    "tpu.trace_stop"() : () -> ()
    %cst_9 = arith.constant dense<0xFF800000> : vector<2x8xf32>
    %28 = vector.multi_reduction <maximumf>, %27, %cst_9 [2] : vector<2x8x8xf32> to vector<2x8xf32>
    %29 = vector.shape_cast %28 : vector<2x8xf32> to vector<2x8x1xf32>
    %30 = vector.broadcast %29 : vector<2x8x1xf32> to vector<2x8x8xf32>
    %31 = arith.subf %27, %30 : vector<2x8x8xf32>
    %32 = math.exp %31 : vector<2x8x8xf32>
    %cst_10 = arith.constant dense<0.000000e+00> : vector<2x8xf32>
    %33 = vector.multi_reduction <add>, %32, %cst_10 [2] : vector<2x8x8xf32> to vector<2x8xf32>
    %34 = vector.shape_cast %33 : vector<2x8xf32> to vector<2x8x1xf32>
    %35 = tpu.reciprocal %34 : vector<2x8x1xf32> -> vector<2x8x1xf32>
    %36 = vector.broadcast %35 : vector<2x8x1xf32> to vector<2x8x8xf32>
    %37 = arith.mulf %32, %36 : vector<2x8x8xf32>
    "tpu.trace_start"() <{level = 10 : i32, message = "bts,bsd->btd"}> : () -> ()
    %cst_11 = arith.constant dense<0.000000e+00> : vector<2x8x8xf32>
    %38 = tpu.matmul %37, %26, %cst_11 {dimension_numbers = #tpu.dot_dimension_numbers<[2], [1], [1], [2], [0, 0, 0, 1, 1, 2], [0], [0]>} : vector<2x8x8xf32>, vector<2x8x8xf32>, vector<2x8x8xf32> -> vector<2x8x8xf32>
    "tpu.trace_stop"() : () -> ()
    %39 = vector.shape_cast %38 : vector<2x8x8xf32> to vector<16x8xf32>
    %40 = vector.extract_strided_slice %20 {offsets = [0, 8], sizes = [16, 8], strides = [1, 1]} : vector<16x32xf32> to vector<16x8xf32>
    %41 = vector.shape_cast %40 : vector<16x8xf32> to vector<2x8x8xf32>
    %42 = vector.extract_strided_slice %13 {offsets = [0, 8], sizes = [16, 8], strides = [1, 1]} : vector<16x32xf32> to vector<16x8xf32>
    %43 = vector.shape_cast %42 : vector<16x8xf32> to vector<2x8x8xf32>
    %44 = vector.extract_strided_slice %17 {offsets = [0, 8], sizes = [16, 8], strides = [1, 1]} : vector<16x32xf32> to vector<16x8xf32>
    %45 = vector.shape_cast %44 : vector<16x8xf32> to vector<2x8x8xf32>
    "tpu.trace_start"() <{level = 10 : i32, message = "btd,bsd->bts"}> : () -> ()
    %cst_12 = arith.constant dense<0.000000e+00> : vector<2x8x8xf32>
    %46 = tpu.matmul %41, %43, %cst_12 {dimension_numbers = #tpu.dot_dimension_numbers<[2], [2], [1], [1], [0, 0, 0, 1, 1, 1], [0], [0]>} : vector<2x8x8xf32>, vector<2x8x8xf32>, vector<2x8x8xf32> -> vector<2x8x8xf32>
    "tpu.trace_stop"() : () -> ()
    %cst_13 = arith.constant dense<0xFF800000> : vector<2x8xf32>
    %47 = vector.multi_reduction <maximumf>, %46, %cst_13 [2] : vector<2x8x8xf32> to vector<2x8xf32>
    %48 = vector.shape_cast %47 : vector<2x8xf32> to vector<2x8x1xf32>
    %49 = vector.broadcast %48 : vector<2x8x1xf32> to vector<2x8x8xf32>
    %50 = arith.subf %46, %49 : vector<2x8x8xf32>
    %51 = math.exp %50 : vector<2x8x8xf32>
    %cst_14 = arith.constant dense<0.000000e+00> : vector<2x8xf32>
    %52 = vector.multi_reduction <add>, %51, %cst_14 [2] : vector<2x8x8xf32> to vector<2x8xf32>
    %53 = vector.shape_cast %52 : vector<2x8xf32> to vector<2x8x1xf32>
    %54 = tpu.reciprocal %53 : vector<2x8x1xf32> -> vector<2x8x1xf32>
    %55 = vector.broadcast %54 : vector<2x8x1xf32> to vector<2x8x8xf32>
    %56 = arith.mulf %51, %55 : vector<2x8x8xf32>
    "tpu.trace_start"() <{level = 10 : i32, message = "bts,bsd->btd"}> : () -> ()
    %cst_15 = arith.constant dense<0.000000e+00> : vector<2x8x8xf32>
    %57 = tpu.matmul %56, %45, %cst_15 {dimension_numbers = #tpu.dot_dimension_numbers<[2], [1], [1], [2], [0, 0, 0, 1, 1, 2], [0], [0]>} : vector<2x8x8xf32>, vector<2x8x8xf32>, vector<2x8x8xf32> -> vector<2x8x8xf32>
    "tpu.trace_stop"() : () -> ()
    %58 = vector.shape_cast %57 : vector<2x8x8xf32> to vector<16x8xf32>
    %59 = vector.extract_strided_slice %20 {offsets = [0, 16], sizes = [16, 8], strides = [1, 1]} : vector<16x32xf32> to vector<16x8xf32>
    %60 = vector.shape_cast %59 : vector<16x8xf32> to vector<2x8x8xf32>
    %61 = vector.extract_strided_slice %13 {offsets = [0, 16], sizes = [16, 8], strides = [1, 1]} : vector<16x32xf32> to vector<16x8xf32>
    %62 = vector.shape_cast %61 : vector<16x8xf32> to vector<2x8x8xf32>
    %63 = vector.extract_strided_slice %17 {offsets = [0, 16], sizes = [16, 8], strides = [1, 1]} : vector<16x32xf32> to vector<16x8xf32>
    %64 = vector.shape_cast %63 : vector<16x8xf32> to vector<2x8x8xf32>
    "tpu.trace_start"() <{level = 10 : i32, message = "btd,bsd->bts"}> : () -> ()
    %cst_16 = arith.constant dense<0.000000e+00> : vector<2x8x8xf32>
    %65 = tpu.matmul %60, %62, %cst_16 {dimension_numbers = #tpu.dot_dimension_numbers<[2], [2], [1], [1], [0, 0, 0, 1, 1, 1], [0], [0]>} : vector<2x8x8xf32>, vector<2x8x8xf32>, vector<2x8x8xf32> -> vector<2x8x8xf32>
    "tpu.trace_stop"() : () -> ()
    %cst_17 = arith.constant dense<0xFF800000> : vector<2x8xf32>
    %66 = vector.multi_reduction <maximumf>, %65, %cst_17 [2] : vector<2x8x8xf32> to vector<2x8xf32>
    %67 = vector.shape_cast %66 : vector<2x8xf32> to vector<2x8x1xf32>
    %68 = vector.broadcast %67 : vector<2x8x1xf32> to vector<2x8x8xf32>
    %69 = arith.subf %65, %68 : vector<2x8x8xf32>
    %70 = math.exp %69 : vector<2x8x8xf32>
    %cst_18 = arith.constant dense<0.000000e+00> : vector<2x8xf32>
    %71 = vector.multi_reduction <add>, %70, %cst_18 [2] : vector<2x8x8xf32> to vector<2x8xf32>
    %72 = vector.shape_cast %71 : vector<2x8xf32> to vector<2x8x1xf32>
    %73 = tpu.reciprocal %72 : vector<2x8x1xf32> -> vector<2x8x1xf32>
    %74 = vector.broadcast %73 : vector<2x8x1xf32> to vector<2x8x8xf32>
    %75 = arith.mulf %70, %74 : vector<2x8x8xf32>
    "tpu.trace_start"() <{level = 10 : i32, message = "bts,bsd->btd"}> : () -> ()
    %cst_19 = arith.constant dense<0.000000e+00> : vector<2x8x8xf32>
    %76 = tpu.matmul %75, %64, %cst_19 {dimension_numbers = #tpu.dot_dimension_numbers<[2], [1], [1], [2], [0, 0, 0, 1, 1, 2], [0], [0]>} : vector<2x8x8xf32>, vector<2x8x8xf32>, vector<2x8x8xf32> -> vector<2x8x8xf32>
    "tpu.trace_stop"() : () -> ()
    %77 = vector.shape_cast %76 : vector<2x8x8xf32> to vector<16x8xf32>
    %78 = vector.extract_strided_slice %20 {offsets = [0, 24], sizes = [16, 8], strides = [1, 1]} : vector<16x32xf32> to vector<16x8xf32>
    %79 = vector.shape_cast %78 : vector<16x8xf32> to vector<2x8x8xf32>
    %80 = vector.extract_strided_slice %13 {offsets = [0, 24], sizes = [16, 8], strides = [1, 1]} : vector<16x32xf32> to vector<16x8xf32>
    %81 = vector.shape_cast %80 : vector<16x8xf32> to vector<2x8x8xf32>
    %82 = vector.extract_strided_slice %17 {offsets = [0, 24], sizes = [16, 8], strides = [1, 1]} : vector<16x32xf32> to vector<16x8xf32>
    %83 = vector.shape_cast %82 : vector<16x8xf32> to vector<2x8x8xf32>
    "tpu.trace_start"() <{level = 10 : i32, message = "btd,bsd->bts"}> : () -> ()
    %cst_20 = arith.constant dense<0.000000e+00> : vector<2x8x8xf32>
    %84 = tpu.matmul %79, %81, %cst_20 {dimension_numbers = #tpu.dot_dimension_numbers<[2], [2], [1], [1], [0, 0, 0, 1, 1, 1], [0], [0]>} : vector<2x8x8xf32>, vector<2x8x8xf32>, vector<2x8x8xf32> -> vector<2x8x8xf32>
    "tpu.trace_stop"() : () -> ()
    %cst_21 = arith.constant dense<0xFF800000> : vector<2x8xf32>
    %85 = vector.multi_reduction <maximumf>, %84, %cst_21 [2] : vector<2x8x8xf32> to vector<2x8xf32>
    %86 = vector.shape_cast %85 : vector<2x8xf32> to vector<2x8x1xf32>
    %87 = vector.broadcast %86 : vector<2x8x1xf32> to vector<2x8x8xf32>
    %88 = arith.subf %84, %87 : vector<2x8x8xf32>
    %89 = math.exp %88 : vector<2x8x8xf32>
    %cst_22 = arith.constant dense<0.000000e+00> : vector<2x8xf32>
    %90 = vector.multi_reduction <add>, %89, %cst_22 [2] : vector<2x8x8xf32> to vector<2x8xf32>
    %91 = vector.shape_cast %90 : vector<2x8xf32> to vector<2x8x1xf32>
    %92 = tpu.reciprocal %91 : vector<2x8x1xf32> -> vector<2x8x1xf32>
    %93 = vector.broadcast %92 : vector<2x8x1xf32> to vector<2x8x8xf32>
    %94 = arith.mulf %89, %93 : vector<2x8x8xf32>
    "tpu.trace_start"() <{level = 10 : i32, message = "bts,bsd->btd"}> : () -> ()
    %cst_23 = arith.constant dense<0.000000e+00> : vector<2x8x8xf32>
    %95 = tpu.matmul %94, %83, %cst_23 {dimension_numbers = #tpu.dot_dimension_numbers<[2], [1], [1], [2], [0, 0, 0, 1, 1, 2], [0], [0]>} : vector<2x8x8xf32>, vector<2x8x8xf32>, vector<2x8x8xf32> -> vector<2x8x8xf32>
    "tpu.trace_stop"() : () -> ()
    %96 = vector.shape_cast %95 : vector<2x8x8xf32> to vector<16x8xf32>
    %97 = tpu.concatenate %39, %58, %77, %96 in 1 : vector<16x8xf32>, vector<16x8xf32>, vector<16x8xf32>, vector<16x8xf32> -> vector<16x32xf32>
    %cst_24 = arith.constant dense<0.000000e+00> : vector<16x32xf32>
    %98 = tpu.matmul %97, %18, %cst_24 {dimension_numbers = #tpu.dot_dimension_numbers<[1], [0], [0], [1], [0, 0, 1, 1], [], []>} : vector<16x32xf32>, vector<32x32xf32>, vector<16x32xf32> -> vector<16x32xf32>
    %99 = vector.extract_strided_slice %2 {offsets = [3, 0], sizes = [1, 32], strides = [1, 1]} : vector<16x64xf32> to vector<1x32xf32>
    %100 = vector.broadcast %99 : vector<1x32xf32> to vector<16x32xf32>
    %101 = arith.addf %98, %100 : vector<16x32xf32>
    %102 = arith.addf %101, %0 : vector<16x32xf32>
    %cst_25 = arith.constant dense<0.000000e+00> : vector<16xf32>
    %103 = vector.multi_reduction <add>, %102, %cst_25 [1] : vector<16x32xf32> to vector<16xf32>
    %104 = vector.shape_cast %103 : vector<16xf32> to vector<16x1xf32>
    %cst_26 = arith.constant 3.200000e+01 : f32
    %105 = vector.broadcast %cst_26 : f32 to vector<16x1xf32>
    %106 = arith.divf %104, %105 : vector<16x1xf32>
    %107 = vector.broadcast %106 : vector<16x1xf32> to vector<16x32xf32>
    %108 = arith.subf %102, %107 : vector<16x32xf32>
    %109 = arith.mulf %108, %108 : vector<16x32xf32>
    %cst_27 = arith.constant dense<0.000000e+00> : vector<16xf32>
    %110 = vector.multi_reduction <add>, %109, %cst_27 [1] : vector<16x32xf32> to vector<16xf32>
    %111 = vector.shape_cast %110 : vector<16xf32> to vector<16x1xf32>
    %cst_28 = arith.constant 3.200000e+01 : f32
    %112 = vector.broadcast %cst_28 : f32 to vector<16x1xf32>
    %113 = arith.divf %111, %112 : vector<16x1xf32>
    %cst_29 = arith.constant 9.99999974E-6 : f32
    %114 = vector.broadcast %cst_29 : f32 to vector<16x1xf32>
    %115 = arith.addf %113, %114 : vector<16x1xf32>
    %116 = math.rsqrt %115 : vector<16x1xf32>
    %117 = vector.broadcast %116 : vector<16x1xf32> to vector<16x32xf32>
    %118 = arith.mulf %108, %117 : vector<16x32xf32>
    %119 = vector.extract_strided_slice %2 {offsets = [4, 0], sizes = [1, 32], strides = [1, 1]} : vector<16x64xf32> to vector<1x32xf32>
    %120 = vector.broadcast %119 : vector<1x32xf32> to vector<16x32xf32>
    %121 = arith.mulf %118, %120 : vector<16x32xf32>
    %122 = vector.extract_strided_slice %2 {offsets = [5, 0], sizes = [1, 32], strides = [1, 1]} : vector<16x64xf32> to vector<1x32xf32>
    %123 = vector.broadcast %122 : vector<1x32xf32> to vector<16x32xf32>
    %124 = arith.addf %121, %123 : vector<16x32xf32>
    %c0_30 = arith.constant 0 : index
    %c0_31 = arith.constant 0 : index
    %125 = vector.load %arg4[%c0_30, %c0_31] : memref<32x64xf32, #tpu.memory_space<vmem>>, vector<32x64xf32>
    %c0_32 = arith.constant 0 : index
    %c0_33 = arith.constant 0 : index
    %126 = vector.load %arg5[%c0_32, %c0_33] : memref<32x64xf32, #tpu.memory_space<vmem>>, vector<32x64xf32>
    %127 = vector.extract_strided_slice %125 {offsets = [0, 0], sizes = [32, 32], strides = [1, 1]} : vector<32x64xf32> to vector<32x32xf32>
    %cst_34 = arith.constant dense<0.000000e+00> : vector<16x32xf32>
    %128 = tpu.matmul %124, %127, %cst_34 {dimension_numbers = #tpu.dot_dimension_numbers<[1], [0], [0], [1], [0, 0, 1, 1], [], []>} : vector<16x32xf32>, vector<32x32xf32>, vector<16x32xf32> -> vector<16x32xf32>
    %129 = vector.extract_strided_slice %2 {offsets = [6, 0], sizes = [1, 32], strides = [1, 1]} : vector<16x64xf32> to vector<1x32xf32>
    %130 = vector.broadcast %129 : vector<1x32xf32> to vector<16x32xf32>
    %131 = arith.addf %128, %130 : vector<16x32xf32>
    %cst_35 = arith.constant dense<0.000000e+00> : vector<16x64xf32>
    %132 = tpu.matmul %1, %126, %cst_35 {dimension_numbers = #tpu.dot_dimension_numbers<[1], [0], [0], [1], [0, 0, 1, 1], [], []>} : vector<16x32xf32>, vector<32x64xf32>, vector<16x64xf32> -> vector<16x64xf32>
    %133 = vector.extract_strided_slice %132 {offsets = [0, 0], sizes = [16, 32], strides = [1, 1]} : vector<16x64xf32> to vector<16x32xf32>
    %134 = vector.extract_strided_slice %2 {offsets = [7, 0], sizes = [1, 32], strides = [1, 1]} : vector<16x64xf32> to vector<1x32xf32>
    %135 = vector.broadcast %134 : vector<1x32xf32> to vector<16x32xf32>
    %136 = arith.addf %133, %135 : vector<16x32xf32>
    %137 = vector.extract_strided_slice %132 {offsets = [0, 32], sizes = [16, 32], strides = [1, 1]} : vector<16x64xf32> to vector<16x32xf32>
    %138 = vector.extract_strided_slice %2 {offsets = [8, 0], sizes = [1, 32], strides = [1, 1]} : vector<16x64xf32> to vector<1x32xf32>
    %139 = vector.broadcast %138 : vector<1x32xf32> to vector<16x32xf32>
    %140 = arith.addf %137, %139 : vector<16x32xf32>
    %141 = vector.extract_strided_slice %125 {offsets = [0, 32], sizes = [32, 32], strides = [1, 1]} : vector<32x64xf32> to vector<32x32xf32>
    %cst_36 = arith.constant 0.353553385 : f32
    %142 = vector.broadcast %cst_36 : f32 to vector<16x32xf32>
    %143 = arith.mulf %131, %142 : vector<16x32xf32>
    %144 = vector.extract_strided_slice %143 {offsets = [0, 0], sizes = [16, 8], strides = [1, 1]} : vector<16x32xf32> to vector<16x8xf32>
    %145 = vector.shape_cast %144 : vector<16x8xf32> to vector<2x8x8xf32>
    %146 = vector.extract_strided_slice %136 {offsets = [0, 0], sizes = [16, 8], strides = [1, 1]} : vector<16x32xf32> to vector<16x8xf32>
    %147 = vector.shape_cast %146 : vector<16x8xf32> to vector<2x8x8xf32>
    %148 = vector.extract_strided_slice %140 {offsets = [0, 0], sizes = [16, 8], strides = [1, 1]} : vector<16x32xf32> to vector<16x8xf32>
    %149 = vector.shape_cast %148 : vector<16x8xf32> to vector<2x8x8xf32>
    "tpu.trace_start"() <{level = 10 : i32, message = "btd,bsd->bts"}> : () -> ()
    %cst_37 = arith.constant dense<0.000000e+00> : vector<2x8x8xf32>
    %150 = tpu.matmul %145, %147, %cst_37 {dimension_numbers = #tpu.dot_dimension_numbers<[2], [2], [1], [1], [0, 0, 0, 1, 1, 1], [0], [0]>} : vector<2x8x8xf32>, vector<2x8x8xf32>, vector<2x8x8xf32> -> vector<2x8x8xf32>
    "tpu.trace_stop"() : () -> ()
    %cst_38 = arith.constant dense<0xFF800000> : vector<2x8xf32>
    %151 = vector.multi_reduction <maximumf>, %150, %cst_38 [2] : vector<2x8x8xf32> to vector<2x8xf32>
    %152 = vector.shape_cast %151 : vector<2x8xf32> to vector<2x8x1xf32>
    %153 = vector.broadcast %152 : vector<2x8x1xf32> to vector<2x8x8xf32>
    %154 = arith.subf %150, %153 : vector<2x8x8xf32>
    %155 = math.exp %154 : vector<2x8x8xf32>
    %cst_39 = arith.constant dense<0.000000e+00> : vector<2x8xf32>
    %156 = vector.multi_reduction <add>, %155, %cst_39 [2] : vector<2x8x8xf32> to vector<2x8xf32>
    %157 = vector.shape_cast %156 : vector<2x8xf32> to vector<2x8x1xf32>
    %158 = tpu.reciprocal %157 : vector<2x8x1xf32> -> vector<2x8x1xf32>
    %159 = vector.broadcast %158 : vector<2x8x1xf32> to vector<2x8x8xf32>
    %160 = arith.mulf %155, %159 : vector<2x8x8xf32>
    "tpu.trace_start"() <{level = 10 : i32, message = "bts,bsd->btd"}> : () -> ()
    %cst_40 = arith.constant dense<0.000000e+00> : vector<2x8x8xf32>
    %161 = tpu.matmul %160, %149, %cst_40 {dimension_numbers = #tpu.dot_dimension_numbers<[2], [1], [1], [2], [0, 0, 0, 1, 1, 2], [0], [0]>} : vector<2x8x8xf32>, vector<2x8x8xf32>, vector<2x8x8xf32> -> vector<2x8x8xf32>
    "tpu.trace_stop"() : () -> ()
    %162 = vector.shape_cast %161 : vector<2x8x8xf32> to vector<16x8xf32>
    %163 = vector.extract_strided_slice %143 {offsets = [0, 8], sizes = [16, 8], strides = [1, 1]} : vector<16x32xf32> to vector<16x8xf32>
    %164 = vector.shape_cast %163 : vector<16x8xf32> to vector<2x8x8xf32>
    %165 = vector.extract_strided_slice %136 {offsets = [0, 8], sizes = [16, 8], strides = [1, 1]} : vector<16x32xf32> to vector<16x8xf32>
    %166 = vector.shape_cast %165 : vector<16x8xf32> to vector<2x8x8xf32>
    %167 = vector.extract_strided_slice %140 {offsets = [0, 8], sizes = [16, 8], strides = [1, 1]} : vector<16x32xf32> to vector<16x8xf32>
    %168 = vector.shape_cast %167 : vector<16x8xf32> to vector<2x8x8xf32>
    "tpu.trace_start"() <{level = 10 : i32, message = "btd,bsd->bts"}> : () -> ()
    %cst_41 = arith.constant dense<0.000000e+00> : vector<2x8x8xf32>
    %169 = tpu.matmul %164, %166, %cst_41 {dimension_numbers = #tpu.dot_dimension_numbers<[2], [2], [1], [1], [0, 0, 0, 1, 1, 1], [0], [0]>} : vector<2x8x8xf32>, vector<2x8x8xf32>, vector<2x8x8xf32> -> vector<2x8x8xf32>
    "tpu.trace_stop"() : () -> ()
    %cst_42 = arith.constant dense<0xFF800000> : vector<2x8xf32>
    %170 = vector.multi_reduction <maximumf>, %169, %cst_42 [2] : vector<2x8x8xf32> to vector<2x8xf32>
    %171 = vector.shape_cast %170 : vector<2x8xf32> to vector<2x8x1xf32>
    %172 = vector.broadcast %171 : vector<2x8x1xf32> to vector<2x8x8xf32>
    %173 = arith.subf %169, %172 : vector<2x8x8xf32>
    %174 = math.exp %173 : vector<2x8x8xf32>
    %cst_43 = arith.constant dense<0.000000e+00> : vector<2x8xf32>
    %175 = vector.multi_reduction <add>, %174, %cst_43 [2] : vector<2x8x8xf32> to vector<2x8xf32>
    %176 = vector.shape_cast %175 : vector<2x8xf32> to vector<2x8x1xf32>
    %177 = tpu.reciprocal %176 : vector<2x8x1xf32> -> vector<2x8x1xf32>
    %178 = vector.broadcast %177 : vector<2x8x1xf32> to vector<2x8x8xf32>
    %179 = arith.mulf %174, %178 : vector<2x8x8xf32>
    "tpu.trace_start"() <{level = 10 : i32, message = "bts,bsd->btd"}> : () -> ()
    %cst_44 = arith.constant dense<0.000000e+00> : vector<2x8x8xf32>
    %180 = tpu.matmul %179, %168, %cst_44 {dimension_numbers = #tpu.dot_dimension_numbers<[2], [1], [1], [2], [0, 0, 0, 1, 1, 2], [0], [0]>} : vector<2x8x8xf32>, vector<2x8x8xf32>, vector<2x8x8xf32> -> vector<2x8x8xf32>
    "tpu.trace_stop"() : () -> ()
    %181 = vector.shape_cast %180 : vector<2x8x8xf32> to vector<16x8xf32>
    %182 = vector.extract_strided_slice %143 {offsets = [0, 16], sizes = [16, 8], strides = [1, 1]} : vector<16x32xf32> to vector<16x8xf32>
    %183 = vector.shape_cast %182 : vector<16x8xf32> to vector<2x8x8xf32>
    %184 = vector.extract_strided_slice %136 {offsets = [0, 16], sizes = [16, 8], strides = [1, 1]} : vector<16x32xf32> to vector<16x8xf32>
    %185 = vector.shape_cast %184 : vector<16x8xf32> to vector<2x8x8xf32>
    %186 = vector.extract_strided_slice %140 {offsets = [0, 16], sizes = [16, 8], strides = [1, 1]} : vector<16x32xf32> to vector<16x8xf32>
    %187 = vector.shape_cast %186 : vector<16x8xf32> to vector<2x8x8xf32>
    "tpu.trace_start"() <{level = 10 : i32, message = "btd,bsd->bts"}> : () -> ()
    %cst_45 = arith.constant dense<0.000000e+00> : vector<2x8x8xf32>
    %188 = tpu.matmul %183, %185, %cst_45 {dimension_numbers = #tpu.dot_dimension_numbers<[2], [2], [1], [1], [0, 0, 0, 1, 1, 1], [0], [0]>} : vector<2x8x8xf32>, vector<2x8x8xf32>, vector<2x8x8xf32> -> vector<2x8x8xf32>
    "tpu.trace_stop"() : () -> ()
    %cst_46 = arith.constant dense<0xFF800000> : vector<2x8xf32>
    %189 = vector.multi_reduction <maximumf>, %188, %cst_46 [2] : vector<2x8x8xf32> to vector<2x8xf32>
    %190 = vector.shape_cast %189 : vector<2x8xf32> to vector<2x8x1xf32>
    %191 = vector.broadcast %190 : vector<2x8x1xf32> to vector<2x8x8xf32>
    %192 = arith.subf %188, %191 : vector<2x8x8xf32>
    %193 = math.exp %192 : vector<2x8x8xf32>
    %cst_47 = arith.constant dense<0.000000e+00> : vector<2x8xf32>
    %194 = vector.multi_reduction <add>, %193, %cst_47 [2] : vector<2x8x8xf32> to vector<2x8xf32>
    %195 = vector.shape_cast %194 : vector<2x8xf32> to vector<2x8x1xf32>
    %196 = tpu.reciprocal %195 : vector<2x8x1xf32> -> vector<2x8x1xf32>
    %197 = vector.broadcast %196 : vector<2x8x1xf32> to vector<2x8x8xf32>
    %198 = arith.mulf %193, %197 : vector<2x8x8xf32>
    "tpu.trace_start"() <{level = 10 : i32, message = "bts,bsd->btd"}> : () -> ()
    %cst_48 = arith.constant dense<0.000000e+00> : vector<2x8x8xf32>
    %199 = tpu.matmul %198, %187, %cst_48 {dimension_numbers = #tpu.dot_dimension_numbers<[2], [1], [1], [2], [0, 0, 0, 1, 1, 2], [0], [0]>} : vector<2x8x8xf32>, vector<2x8x8xf32>, vector<2x8x8xf32> -> vector<2x8x8xf32>
    "tpu.trace_stop"() : () -> ()
    %200 = vector.shape_cast %199 : vector<2x8x8xf32> to vector<16x8xf32>
    %201 = vector.extract_strided_slice %143 {offsets = [0, 24], sizes = [16, 8], strides = [1, 1]} : vector<16x32xf32> to vector<16x8xf32>
    %202 = vector.shape_cast %201 : vector<16x8xf32> to vector<2x8x8xf32>
    %203 = vector.extract_strided_slice %136 {offsets = [0, 24], sizes = [16, 8], strides = [1, 1]} : vector<16x32xf32> to vector<16x8xf32>
    %204 = vector.shape_cast %203 : vector<16x8xf32> to vector<2x8x8xf32>
    %205 = vector.extract_strided_slice %140 {offsets = [0, 24], sizes = [16, 8], strides = [1, 1]} : vector<16x32xf32> to vector<16x8xf32>
    %206 = vector.shape_cast %205 : vector<16x8xf32> to vector<2x8x8xf32>
    "tpu.trace_start"() <{level = 10 : i32, message = "btd,bsd->bts"}> : () -> ()
    %cst_49 = arith.constant dense<0.000000e+00> : vector<2x8x8xf32>
    %207 = tpu.matmul %202, %204, %cst_49 {dimension_numbers = #tpu.dot_dimension_numbers<[2], [2], [1], [1], [0, 0, 0, 1, 1, 1], [0], [0]>} : vector<2x8x8xf32>, vector<2x8x8xf32>, vector<2x8x8xf32> -> vector<2x8x8xf32>
    "tpu.trace_stop"() : () -> ()
    %cst_50 = arith.constant dense<0xFF800000> : vector<2x8xf32>
    %208 = vector.multi_reduction <maximumf>, %207, %cst_50 [2] : vector<2x8x8xf32> to vector<2x8xf32>
    %209 = vector.shape_cast %208 : vector<2x8xf32> to vector<2x8x1xf32>
    %210 = vector.broadcast %209 : vector<2x8x1xf32> to vector<2x8x8xf32>
    %211 = arith.subf %207, %210 : vector<2x8x8xf32>
    %212 = math.exp %211 : vector<2x8x8xf32>
    %cst_51 = arith.constant dense<0.000000e+00> : vector<2x8xf32>
    %213 = vector.multi_reduction <add>, %212, %cst_51 [2] : vector<2x8x8xf32> to vector<2x8xf32>
    %214 = vector.shape_cast %213 : vector<2x8xf32> to vector<2x8x1xf32>
    %215 = tpu.reciprocal %214 : vector<2x8x1xf32> -> vector<2x8x1xf32>
    %216 = vector.broadcast %215 : vector<2x8x1xf32> to vector<2x8x8xf32>
    %217 = arith.mulf %212, %216 : vector<2x8x8xf32>
    "tpu.trace_start"() <{level = 10 : i32, message = "bts,bsd->btd"}> : () -> ()
    %cst_52 = arith.constant dense<0.000000e+00> : vector<2x8x8xf32>
    %218 = tpu.matmul %217, %206, %cst_52 {dimension_numbers = #tpu.dot_dimension_numbers<[2], [1], [1], [2], [0, 0, 0, 1, 1, 2], [0], [0]>} : vector<2x8x8xf32>, vector<2x8x8xf32>, vector<2x8x8xf32> -> vector<2x8x8xf32>
    "tpu.trace_stop"() : () -> ()
    %219 = vector.shape_cast %218 : vector<2x8x8xf32> to vector<16x8xf32>
    %220 = tpu.concatenate %162, %181, %200, %219 in 1 : vector<16x8xf32>, vector<16x8xf32>, vector<16x8xf32>, vector<16x8xf32> -> vector<16x32xf32>
    %cst_53 = arith.constant dense<0.000000e+00> : vector<16x32xf32>
    %221 = tpu.matmul %220, %141, %cst_53 {dimension_numbers = #tpu.dot_dimension_numbers<[1], [0], [0], [1], [0, 0, 1, 1], [], []>} : vector<16x32xf32>, vector<32x32xf32>, vector<16x32xf32> -> vector<16x32xf32>
    %222 = vector.extract_strided_slice %2 {offsets = [9, 0], sizes = [1, 32], strides = [1, 1]} : vector<16x64xf32> to vector<1x32xf32>
    %223 = vector.broadcast %222 : vector<1x32xf32> to vector<16x32xf32>
    %224 = arith.addf %221, %223 : vector<16x32xf32>
    %225 = arith.addf %224, %124 : vector<16x32xf32>
    %cst_54 = arith.constant dense<0.000000e+00> : vector<16xf32>
    %226 = vector.multi_reduction <add>, %225, %cst_54 [1] : vector<16x32xf32> to vector<16xf32>
    %227 = vector.shape_cast %226 : vector<16xf32> to vector<16x1xf32>
    %cst_55 = arith.constant 3.200000e+01 : f32
    %228 = vector.broadcast %cst_55 : f32 to vector<16x1xf32>
    %229 = arith.divf %227, %228 : vector<16x1xf32>
    %230 = vector.broadcast %229 : vector<16x1xf32> to vector<16x32xf32>
    %231 = arith.subf %225, %230 : vector<16x32xf32>
    %232 = arith.mulf %231, %231 : vector<16x32xf32>
    %cst_56 = arith.constant dense<0.000000e+00> : vector<16xf32>
    %233 = vector.multi_reduction <add>, %232, %cst_56 [1] : vector<16x32xf32> to vector<16xf32>
    %234 = vector.shape_cast %233 : vector<16xf32> to vector<16x1xf32>
    %cst_57 = arith.constant 3.200000e+01 : f32
    %235 = vector.broadcast %cst_57 : f32 to vector<16x1xf32>
    %236 = arith.divf %234, %235 : vector<16x1xf32>
    %cst_58 = arith.constant 9.99999974E-6 : f32
    %237 = vector.broadcast %cst_58 : f32 to vector<16x1xf32>
    %238 = arith.addf %236, %237 : vector<16x1xf32>
    %239 = math.rsqrt %238 : vector<16x1xf32>
    %240 = vector.broadcast %239 : vector<16x1xf32> to vector<16x32xf32>
    %241 = arith.mulf %231, %240 : vector<16x32xf32>
    %242 = vector.extract_strided_slice %2 {offsets = [10, 0], sizes = [1, 32], strides = [1, 1]} : vector<16x64xf32> to vector<1x32xf32>
    %243 = vector.broadcast %242 : vector<1x32xf32> to vector<16x32xf32>
    %244 = arith.mulf %241, %243 : vector<16x32xf32>
    %245 = vector.extract_strided_slice %2 {offsets = [11, 0], sizes = [1, 32], strides = [1, 1]} : vector<16x64xf32> to vector<1x32xf32>
    %246 = vector.broadcast %245 : vector<1x32xf32> to vector<16x32xf32>
    %247 = arith.addf %244, %246 : vector<16x32xf32>
    %c0_59 = arith.constant 0 : index
    %c0_60 = arith.constant 0 : index
    %248 = vector.load %arg6[%c0_59, %c0_60] : memref<32x64xf32, #tpu.memory_space<vmem>>, vector<32x64xf32>
    %cst_61 = arith.constant dense<0.000000e+00> : vector<16x64xf32>
    %249 = tpu.matmul %247, %248, %cst_61 {dimension_numbers = #tpu.dot_dimension_numbers<[1], [0], [0], [1], [0, 0, 1, 1], [], []>} : vector<16x32xf32>, vector<32x64xf32>, vector<16x64xf32> -> vector<16x64xf32>
    %250 = vector.extract_strided_slice %2 {offsets = [12, 0], sizes = [1, 64], strides = [1, 1]} : vector<16x64xf32> to vector<1x64xf32>
    %251 = vector.broadcast %250 : vector<1x64xf32> to vector<16x64xf32>
    %252 = arith.addf %249, %251 : vector<16x64xf32>
    %cst_62 = arith.constant 0.000000e+00 : f32
    %253 = vector.broadcast %cst_62 : f32 to vector<16x64xf32>
    %254 = arith.maximumf %252, %253 : vector<16x64xf32>
    %c0_63 = arith.constant 0 : index
    %c0_64 = arith.constant 0 : index
    %255 = vector.load %arg7[%c0_63, %c0_64] : memref<64x32xf32, #tpu.memory_space<vmem>>, vector<64x32xf32>
    %cst_65 = arith.constant dense<0.000000e+00> : vector<16x32xf32>
    %256 = tpu.matmul %254, %255, %cst_65 {dimension_numbers = #tpu.dot_dimension_numbers<[1], [0], [0], [1], [0, 0, 1, 1], [], []>} : vector<16x64xf32>, vector<64x32xf32>, vector<16x32xf32> -> vector<16x32xf32>
    %257 = vector.extract_strided_slice %2 {offsets = [13, 0], sizes = [1, 32], strides = [1, 1]} : vector<16x64xf32> to vector<1x32xf32>
    %258 = vector.broadcast %257 : vector<1x32xf32> to vector<16x32xf32>
    %259 = arith.addf %256, %258 : vector<16x32xf32>
    %260 = arith.addf %259, %247 : vector<16x32xf32>
    %cst_66 = arith.constant dense<0.000000e+00> : vector<16xf32>
    %261 = vector.multi_reduction <add>, %260, %cst_66 [1] : vector<16x32xf32> to vector<16xf32>
    %262 = vector.shape_cast %261 : vector<16xf32> to vector<16x1xf32>
    %cst_67 = arith.constant 3.200000e+01 : f32
    %263 = vector.broadcast %cst_67 : f32 to vector<16x1xf32>
    %264 = arith.divf %262, %263 : vector<16x1xf32>
    %265 = vector.broadcast %264 : vector<16x1xf32> to vector<16x32xf32>
    %266 = arith.subf %260, %265 : vector<16x32xf32>
    %267 = arith.mulf %266, %266 : vector<16x32xf32>
    %cst_68 = arith.constant dense<0.000000e+00> : vector<16xf32>
    %268 = vector.multi_reduction <add>, %267, %cst_68 [1] : vector<16x32xf32> to vector<16xf32>
    %269 = vector.shape_cast %268 : vector<16xf32> to vector<16x1xf32>
    %cst_69 = arith.constant 3.200000e+01 : f32
    %270 = vector.broadcast %cst_69 : f32 to vector<16x1xf32>
    %271 = arith.divf %269, %270 : vector<16x1xf32>
    %cst_70 = arith.constant 9.99999974E-6 : f32
    %272 = vector.broadcast %cst_70 : f32 to vector<16x1xf32>
    %273 = arith.addf %271, %272 : vector<16x1xf32>
    %274 = math.rsqrt %273 : vector<16x1xf32>
    %275 = vector.broadcast %274 : vector<16x1xf32> to vector<16x32xf32>
    %276 = arith.mulf %266, %275 : vector<16x32xf32>
    %277 = vector.extract_strided_slice %2 {offsets = [14, 0], sizes = [1, 32], strides = [1, 1]} : vector<16x64xf32> to vector<1x32xf32>
    %278 = vector.broadcast %277 : vector<1x32xf32> to vector<16x32xf32>
    %279 = arith.mulf %276, %278 : vector<16x32xf32>
    %280 = vector.extract_strided_slice %2 {offsets = [15, 0], sizes = [1, 32], strides = [1, 1]} : vector<16x64xf32> to vector<1x32xf32>
    %281 = vector.broadcast %280 : vector<1x32xf32> to vector<16x32xf32>
    %282 = arith.addf %279, %281 : vector<16x32xf32>
    %c0_71 = arith.constant 0 : index
    %c0_72 = arith.constant 0 : index
    %283 = vector.load %arg9[%c0_71, %c0_72] : memref<16x32xf32, #tpu.memory_space<vmem>>, vector<16x32xf32>
    tpu.vector_store %arg9[%c0_71, %c0_72], %282 {strides = array<i32>} : memref<16x32xf32, #tpu.memory_space<vmem>>, vector<16x32xf32>,
    %c0_73 = arith.constant 0 : index
    %c0_74 = arith.constant 0 : index
    %284 = vector.load %arg10[%c0_73, %c0_74] : memref<16x32xf32, #tpu.memory_space<vmem>>, vector<16x32xf32>
    tpu.vector_store %arg10[%c0_73, %c0_74], %220 {strides = array<i32>} : memref<16x32xf32, #tpu.memory_space<vmem>>, vector<16x32xf32>,
    return
  }
  func.func @transform_0(%arg0: i32) -> (i32, i32) {
    %c0_i32 = arith.constant 0 : i32
    %c0_i32_0 = arith.constant 0 : i32
    %c0_i32_1 = arith.constant 0 : i32
    return %c0_i32, %c0_i32_0 : i32, i32
  }
  func.func @transform_1(%arg0: i32) -> (i32, i32) {
    %c0_i32 = arith.constant 0 : i32
    %c0_i32_0 = arith.constant 0 : i32
    %c0_i32_1 = arith.constant 0 : i32
    return %c0_i32, %c0_i32_0 : i32, i32
  }
  func.func @transform_2(%arg0: i32) -> (i32, i32) {
    %c0_i32 = arith.constant 0 : i32
    %c0_i32_0 = arith.constant 0 : i32
    %c0_i32_1 = arith.constant 0 : i32
    return %c0_i32, %c0_i32_0 : i32, i32
  }
  func.func @transform_3(%arg0: i32) -> (i32, i32) {
    %c0_i32 = arith.constant 0 : i32
    %c0_i32_0 = arith.constant 0 : i32
    %c0_i32_1 = arith.constant 0 : i32
    return %c0_i32, %c0_i32_0 : i32, i32
  }
  func.func @transform_4(%arg0: i32) -> (i32, i32) {
    %c0_i32 = arith.constant 0 : i32
    %c0_i32_0 = arith.constant 0 : i32
    %c0_i32_1 = arith.constant 0 : i32
    return %c0_i32, %c0_i32_0 : i32, i32
  }
  func.func @transform_5(%arg0: i32) -> (i32, i32) {
    %c0_i32 = arith.constant 0 : i32
    %c0_i32_0 = arith.constant 0 : i32
    %c0_i32_1 = arith.constant 0 : i32
    return %c0_i32, %c0_i32_0 : i32, i32
  }
  func.func @transform_6(%arg0: i32) -> (i32, i32) {
    %c0_i32 = arith.constant 0 : i32
    %c0_i32_0 = arith.constant 0 : i32
    %c0_i32_1 = arith.constant 0 : i32
    return %c0_i32, %c0_i32_0 : i32, i32
  }
  func.func @transform_7(%arg0: i32) -> (i32, i32) {
    %c0_i32 = arith.constant 0 : i32
    %c0_i32_0 = arith.constant 0 : i32
    %c0_i32_1 = arith.constant 0 : i32
    return %c0_i32, %c0_i32_0 : i32, i32
  }
  func.func @transform_8(%arg0: i32) -> (i32, i32) {
    %c0_i32 = arith.constant 0 : i32
    %c0_i32_0 = arith.constant 0 : i32
    %c0_i32_1 = arith.constant 0 : i32
    return %c0_i32, %c0_i32_0 : i32, i32
  }
  func.func @transform_9(%arg0: i32) -> (i32, i32) {
    %c0_i32 = arith.constant 0 : i32
    %c0_i32_0 = arith.constant 0 : i32
    %c0_i32_1 = arith.constant 0 : i32
    return %c0_i32, %c0_i32_0 : i32, i32
  }
}

</mosaic_0001>

<bundles_post_ra>
// kernel: tpu_custom_call.1
= control target key start
LH: loop header
LB: loop body
LE: loop exit
PB: predicated region body
PF: predicated region fallthrough
CT: control target
= control target key end

     0   :  { %15 = vsyncpa [#allocation3], 0  ;;  %s5051_s0 = inlined_call_operand.hbm [shape: f32[16,32], index: 0, kind: input, shape index: {}]   ;;  %s5052_s1 = inlined_call_operand.hbm [shape: f32[16,32], index: 1, kind: input, shape index: {}]   ;;  %s5053_s2 = inlined_call_operand.vmem [shape: f32[32,128], index: 2, kind: input, shape index: {}]   ;;  %s5054_s3 = inlined_call_operand.vmem [shape: f32[32,64], index: 3, kind: input, shape index: {}]   ;;  %s5055_s4 = inlined_call_operand.vmem [shape: f32[32,64], index: 4, kind: input, shape index: {}]   ;;  %s5056_s5 = inlined_call_operand.hbm [shape: f32[32,64], index: 5, kind: input, shape index: {}]   ;;  %s5057_s6 = inlined_call_operand.vmem [shape: f32[64,32], index: 6, kind: input, shape index: {}]   ;;  %s5058_s7 = inlined_call_operand.vmem [shape: f32[16,64], index: 7, kind: input, shape index: {}]   ;;  %s5059_s8 = inlined_call_operand.hbm [shape: f32[16,32], index: 8, kind: output, shape index: {0}]   ;;  %s5060_s9 = inlined_call_operand.hbm [shape: f32[16,32], index: 9, kind: output, shape index: {1}]  }
   0x1   :  { %16 = vsyncpa [#allocation6], 0 }
   0x2   :  { %17 = vsyncpa [#allocation4], 0 }
   0x3   :  { %18 = vsyncpa [#allocation10], 0  ;;  %s4353_s30 = smov [#allocation5]   ;;  %s4354_s11 = smov [#allocation2]  }
   0x4   :  { %s36_s10 = sshll.u32 %s4353_s30, 4  ;;  %s24_s12 = sshll.u32 %s4354_s11, 4  ;;  %s37_s10 = int_to_ptr.vmem [resolvable:$true] %s36_s10  ;;  %s4426_s12 = int_to_ptr.vmem [resolvable:$true] %s24_s12 }
   0x5   :  { %s4235_s15 = scalar_lea.hbm %s5052_s1, 256 }
   0x6   :  { %p4236_p0 = scmp.ne.s32.totalorder %s5052_s1, %s4235_s15  ;;  %p4239_p1 = scmp.lt.u32.totalorder %s4235_s15, %s5052_s1 }
   0x8   :  { %p4241_p2 = pnand %p4239_p1, %p4236_p0 }
   0xa   :  { %4244 = shalt.err (!%p4241_p2)
}
   0xb   :  { %s4245_s20 = scalar_lea.vmem %s37_s10, 256  ;;  %p4250_p4 = scmp.lt.s32.totalorder %s37_s10, %s37_s10 }
   0xc   :  { %p4246_p3 = scmp.ne.s32.totalorder %s37_s10, %s4245_s20  ;;  %p4251_p5 = scmp.lt.s32.totalorder %s4245_s20, %s4245_s20 }
   0xe   :  { %p4252_p6 = por %p4251_p5, %p4250_p4 }
  0x10   :  { %p4253_p7 = pnand %p4252_p6, %p4246_p3 }
  0x12   :  { %4256 = shalt.err (!%p4253_p7)
}
  0x13   :  { %s4355_s21 = smov 128   ;;  %s4356_s22 = smov 8  }
  0x14   :  { %42 = dma.hbm_to_vmem [thread:$0]  %s5052_s1, 256, %s37_s10, [#allocation6], %s4355_s21, %s4355_s21, %s4356_s22  }
  0x15   :  { %s4257_s27 = scalar_lea.hbm %s5051_s0, 256 }
  0x16   :  { %p4258_p8 = scmp.ne.s32.totalorder %s5051_s0, %s4257_s27  ;;  %p4261_p9 = scmp.lt.u32.totalorder %s4257_s27, %s5051_s0 }
  0x18   :  { %p4263_p10 = pnand %p4261_p9, %p4258_p8 }
  0x1a   :  { %4266 = shalt.err (!%p4263_p10)
}
  0x1b   :  { %s4267_s13 = scalar_lea.vmem %s4426_s12, 256  ;;  %p4272_p12 = scmp.lt.s32.totalorder %s4426_s12, %s4426_s12 }
  0x1c   :  { %p4268_p11 = scmp.ne.s32.totalorder %s4426_s12, %s4267_s13  ;;  %p4273_p13 = scmp.lt.s32.totalorder %s4267_s13, %s4267_s13 }
  0x1e   :  { %p4274_p0 = por %p4273_p13, %p4272_p12 }
  0x20   :  { %p4275_p1 = pnand %p4274_p0, %p4268_p11 }
  0x22   :  { %4278 = shalt.err (!%p4275_p1)
}
  0x23   :  { %30 = dma.hbm_to_vmem [thread:$0]  %s5051_s0, 256, %s4426_s12, [#allocation3], %s4355_s21, %s4355_s21, %s4356_s22  }
  0x24   :  { %s4357_s14 = smov [#allocation7]   ;;  %s4279_s18 = scalar_lea.hbm %s5056_s5, 512 }
  0x25   :  { %s54_s15 = sshll.u32 %s4357_s14, 4  ;;  %p4280_p2 = scmp.ne.s32.totalorder %s5056_s5, %s4279_s18  ;;  %s55_s15 = int_to_ptr.vmem [resolvable:$true] %s54_s15 }
  0x26   :  { %p4283_p3 = scmp.lt.u32.totalorder %s4279_s18, %s5056_s5 }
  0x28   :  { %p4285_p4 = pnand %p4283_p3, %p4280_p2 }
  0x2a   :  { %4288 = shalt.err (!%p4285_p4)
}
  0x2b   :  { %s4289_s25 = scalar_lea.vmem %s55_s15, 512  ;;  %p4294_p6 = scmp.lt.s32.totalorder %s55_s15, %s55_s15 }
  0x2c   :  { %p4290_p5 = scmp.ne.s32.totalorder %s55_s15, %s4289_s25  ;;  %p4295_p7 = scmp.lt.s32.totalorder %s4289_s25, %s4289_s25 }
  0x2e   :  { %p4296_p8 = por %p4295_p7, %p4294_p6 }
  0x30   :  { %p4297_p9 = pnand %p4296_p8, %p4290_p5 }
  0x32   :  { %4300 = shalt.err (!%p4297_p9)
}
  0x33   :  { %60 = dma.hbm_to_vmem [thread:$0]  %s5056_s5, 512, %s55_s15, [#allocation6], %s4355_s21, %s4355_s21, %s4356_s22  }
  0x34   :  { %4345 = dma.done.wait [#allocation3], 256  }
  0x35   :  { %4346 = vsyncadd [#allocation3], 4294967040 }
  0x36   :  { %4347 = dma.done.wait [#allocation6], 768  }
  0x37   :  { %4348 = vsyncadd [#allocation6], 4294966528  ;;  %v166_v0 = vlaneseq  ;;  %vm84_vm0 = vcmask 261120   ;;  %v4484_v3 = vld [vmem:[%s5053_s2] sm:$0xff]  ;;  %v4489_v4 = vld [vmem:[%s5053_s2 + $0x8] sm:$0xff]  ;;  %v4359_v14 = vmov 0.0  }
  0x38   :  { %v4494_v5 = vld [vmem:[%s5053_s2 + $0x10] sm:$0xff]  ;;  %v4139_v6 = vpack.i.bf16 %v4489_v4, %v4484_v3  ;;  %v4052_v7 = vpack.c.bf16 %v4489_v4, %v4484_v3  ;;  %v4503_v8 = vld [vmem:[%s5053_s2 + $0x18] sm:$0xff]  ;;  %v4505_v9 = vld [vmem:[#allocation2] sm:$0xff]  ;;  %s4358_s2 = smov 32   ;;  %3828 = vmatprep.subr.mxu0 %v4359_v14  ;;  %vm4360_vm1 = vmmov 0   ;;  %s4361_s14 = smov 96  }
  0x39   :  { %v4478_v1 = vshrl.u32 %v166_v0, 7  ;;  %v4056_v10 = vpack.c.bf16 %v4503_v8, %v4494_v5  ;;  %3815 = vmatprep.mubr.msk.f32.mxu1 %vm84_vm0, %v4505_v9  ;;  %v4514_v11 = vld [vmem:[%s5058_s7] sm:$0xff]  ;;  %v4520_v13 = vld [vmem:[#allocation2 + $0x8] sm:$0xff]  ;;  %3830 = vmatprep.mubr.msk.f32.mxu0 %vm4360_vm1, %v4359_v14  ;;  %vm197_vm2 = vcmask 64512   ;;  %s4362_s15 = smov 64   ;;  %s4363_s16 = smov 88  }
  0x3a   :  { %4053 = vmatprep.subr.bf16.mxu1 %v4052_v7  ;;  %s4364_s17 = smov 120   ;;  %s4365_s18 = smov 56   ;;  %vm1546_vm3 = vcmask 195584   ;;  %vm1543_vm4 = vcmask 130048   ;;  %vm3475_vm5 = vcmask 523264  }
  0x3b   :  { %v174_v2 = vsub.s32 1, %v4478_v1  ;;  %4055 = vmatpush3.bf16.msra.mxu1 %v4052_v7  ;;  %v168_v20 = vsub.s32 0, %v4478_v1  ;;  %v184_v34 = vsub.s32 2, %v4478_v1  ;;  %s4366_s19 = smov 80   ;;  %s4367_s20 = smov 112  }
  0x3c   :  { %4057 = vmatprep.subr.bf16.mxu1 %v4056_v10  ;;  %s4368_s23 = smov 48   ;;  %s4369_s24 = smov 72  }
  0x3d   :  { %v175_v12 = vrot.slane %v4514_v11, %v174_v2  ;;  %v169_v21 = vrot.slane %v4514_v11, %v168_v20  ;;  %v185_v35 = vrot.slane %v4514_v11, %v184_v34  ;;  %s4370_s25 = smov 104   ;;  %s4371_s0 = smov 40  }
  0x3e   :  { %s4372_s12 = smov 16   ;;  %s4373_s26 = smov 24  }
  0x3f   :  { %177 = vrot.lane.b32.xlu0 %v175_v12, %s4358_s2  ;;  %4059 = vmatpush3.bf16.msra.mxu1 %v4056_v10 }
  0x40   :  { %3818 = vmatprep.subr.mxu1 %v4359_v14 }
  0x42   :  { %3816 = vmatmul.mubr.msk.f32.vlgmr.msra.gmra.mrb[0].mxu1 %vm84_vm0, %v4520_v13 }
  0x43   :  { %3820 = vmatprep.mubr.msk.f32.mxu1 %vm4360_vm1, %v4359_v14 }
  0xb1   :  { %v178_v15 = vpop.permute.xlu0 %177 }
 0x115   :  { %v3817_v16 = vpop.f32.mrb[0].mxu1 }
 0x116   :  { %v4530_v17 = vadd.f32 %v3817_v16, %v178_v15  ;;  %v157_v18 = vpop.f32.mrb[1].mxu1  ;;  %v171_v24 = vadd.f32 %v3817_v16, %v169_v21 }
 0x117   :  { %v4532_v19 = vadd.f32 %v178_v15, %v157_v18  ;;  %v170_v22 = vadd.f32 %v169_v21, %v157_v18 }
 0x118   :  { %274 = vrot.lane.b32.xlu1 %v4530_v17, %s4361_s14  ;;  %v4551_v27 = vmul.f32 0.35355338, %v171_v24 }
 0x119   :  { %195 = vrot.lane.b32.xlu0 %v4532_v19, %s4361_s14  ;;  %v4543_v25 = vmul.f32 0.35355338, %v170_v22 }
 0x18a   :  { %v275_v26 = vpop.permute.xlu1 %274 }
 0x18b   :  { %v196_v23 = vpop.permute.xlu0 %195 }
 0x18c   :  { %3819 = vmatpush3.xpose.msk.msra.mxu1 %vm197_vm2, %v196_v23 }
 0x18d   :  { %3823 = vmatprep.subr.mxu1 %v4359_v14 }
 0x18f   :  { %3821 = vmatmul.mubr.msk.f32.vlgmr.msra.gmra.mrb[2].mxu1 %vm197_vm2, %v4543_v25 }
 0x190   :  { %3824 = vmatpush3.xpose.msk.msra.mxu1 %vm197_vm2, %v275_v26  ;;  %3825 = vmatprep.mubr.msk.f32.mxu1 %vm4360_vm1, %v4359_v14 }
 0x191   :  { %3833 = vmatprep.subr.mxu1 %v4359_v14 }
 0x193   :  { %3826 = vmatmul.mubr.msk.f32.vlgmr.msra.gmra.mrb[4].mxu1 %vm197_vm2, %v4551_v27 }
 0x194   :  { %3835 = vmatprep.mubr.msk.f32.mxu1 %vm4360_vm1, %v4359_v14 }
 0x262   :  { %v269_v28 = vpop.f32.mrb[2].mxu1 }
 0x263   :  { %v3822_v29 = vpop.f32.mrb[3].mxu1  ;;  %v351_v30 = vsel %vm197_vm2, %v269_v28, -inf }
 0x264   :  { %352 = vmax.xlane.f32.xlu1 %v351_v30 }
 0x266   :  { %v347_v31 = vpop.f32.mrb[4].mxu1 }
 0x267   :  { %v3827_v32 = vpop.f32.mrb[5].mxu1  ;;  %v354_v33 = vsel %vm197_vm2, %v347_v31, -inf }
 0x268   :  { %355 = vmax.xlane.f32.xlu0 %v354_v33 }
 0x27e   :  { %187 = vrot.lane.b32.xlu0 %v185_v35, %s4362_s15 }
 0x2f1   :  { %v353_v40 = vpop.xlane.xlu1 %352 }
 0x2f2   :  { %v357_v41 = vsub.f32 %v269_v28, %v353_v40 }
 0x2f4   :  { %v359_v42 = vmul.f32 1.442695, %v357_v41 }
 0x2f5   :  { %v356_v36 = vpop.xlane.xlu0 %355 }
 0x2f6   :  { %v358_v43 = vsub.f32 %v347_v31, %v356_v36  ;;  %4159 = vpow2.f32 %v359_v42 }
 0x2f8   :  { %v361_v44 = vmul.f32 1.442695, %v358_v43 }
 0x2f9   :  { %v188_v37 = vpop.permute.xlu0 %187 }
 0x2fa   :  { %v4564_v38 = vadd.f32 %v188_v37, %v157_v18  ;;  %v4566_v39 = vadd.f32 %v3817_v16, %v188_v37  ;;  %4161 = vpow2.f32 %v361_v44 }
 0x2fc   :  { %451 = vrot.lane.b32.xlu0 %v4566_v39, %s4362_s15  ;;  %374 = vrot.lane.b32.xlu1 %v4564_v38, %s4362_s15 }
 0x300   :  { %529 = vrot.lane.b32.xlu0 %v4532_v19, %s4363_s16  ;;  %607 = vrot.lane.b32.xlu1 %v4530_v17, %s4363_s16  ;;  %v4160_v45 = vpop.eup %4159 }
 0x301   :  { %v363_v46 = vsel %vm197_vm2, %v4160_v45, 0.0 }
 0x304   :  { %527 = vrot.lane.b32.xlu0 %v4543_v25, %s4364_s17  ;;  %v4162_v47 = vpop.eup %4161 }
 0x305   :  { %v366_v48 = vsel %vm197_vm2, %v4162_v47, 0.0 }
 0x324   :  { %364 = vadd.xlane.f32.xlu1 %v363_v46 }
 0x328   :  { %367 = vadd.xlane.f32.xlu1 %v366_v48 }
 0x339   :  { %605 = vrot.lane.b32.xlu1 %v4551_v27, %s4364_s17 }
 0x36e   :  { %v452_v49 = vpop.permute.xlu0 %451  ;;  %v375_v50 = vpop.permute.xlu1 %374 }
 0x36f   :  { %3829 = vmatpush3.msra.mxu0 %v375_v50  ;;  %3834 = vmatpush3.msra.mxu1 %v452_v49 }
 0x370   :  { %3838 = vmatprep.subr.mxu0 %v4359_v14  ;;  %3843 = vmatprep.subr.mxu1 %v4359_v14 }
 0x372   :  { %v608_v51 = vpop.permute.xlu1 %607  ;;  %v530_v55 = vpop.permute.xlu0 %529 }
 0x376   :  { %v528_v59 = vpop.permute.xlu0 %527 }
 0x3b1   :  { %v365_v52 = vpop.xlane.xlu1 %364 }
 0x3b2   :  { %4163 = vrcp.f32 %v365_v52 }
 0x3b5   :  { %v368_v53 = vpop.xlane.xlu1 %367 }
 0x3b6   :  { %4165 = vrcp.f32 %v368_v53 }
 0x3b9   :  { %v606_v60 = vpop.permute.xlu1 %605 }
 0x3bc   :  { %v4164_v54 = vpop.eup %4163 }
 0x3bd   :  { %v371_v56 = vmul.f32 %v4164_v54, %v4160_v45 }
 0x3bf   :  { %3831 = vmatmul.mubr.msk.f32.vlgmr.msra.gmra.mrb[0].mxu0 %vm197_vm2, %v371_v56 }
 0x3c0   :  { %v4166_v57 = vpop.eup %4165  ;;  %3839 = vmatpush3.xpose.msk.msra.mxu0 %vm197_vm2, %v530_v55  ;;  %3840 = vmatprep.mubr.msk.f32.mxu0 %vm4360_vm1, %v4359_v14 }
 0x3c1   :  { %v372_v58 = vmul.f32 %v4166_v57, %v4162_v47  ;;  %3848 = vmatprep.subr.mxu0 %v4359_v14 }
 0x3c3   :  { %3836 = vmatmul.mubr.msk.f32.vlgmr.msra.gmra.mrb[6].mxu1 %vm197_vm2, %v372_v58  ;;  %3841 = vmatmul.mubr.msk.f32.vlgmr.msra.gmra.mrb[2].mxu0 %vm197_vm2, %v528_v59 }
 0x3c4   :  { %3844 = vmatpush3.xpose.msk.msra.mxu1 %vm197_vm2, %v608_v51  ;;  %3845 = vmatprep.mubr.msk.f32.mxu1 %vm4360_vm1, %v4359_v14 }
 0x3c5   :  { %3853 = vmatprep.subr.mxu1 %v4359_v14  ;;  %3850 = vmatprep.mubr.msk.f32.mxu0 %vm4360_vm1, %v4359_v14 }
 0x3c7   :  { %3846 = vmatmul.mubr.msk.f32.vlgmr.msra.gmra.mrb[8].mxu1 %vm197_vm2, %v606_v60 }
 0x3c8   :  { %3855 = vmatprep.mubr.msk.f32.mxu1 %vm4360_vm1, %v4359_v14 }
 0x492   :  { %v4598_v61 = vpop.f32.mrb[0].mxu0 }
 0x493   :  { %v3832_v62 = vpop.f32.mrb[1].mxu0 }
 0x496   :  { %v4600_v63 = vpop.f32.mrb[6].mxu1  ;;  %v601_v0 = vpop.f32.mrb[2].mxu0 }
 0x497   :  { %v3837_v7 = vpop.f32.mrb[7].mxu1  ;;  %v3842_v10 = vpop.f32.mrb[3].mxu0  ;;  %v683_v12 = vsel %vm197_vm2, %v601_v0, -inf }
 0x498   :  { %684 = vmax.xlane.f32.xlu0 %v683_v12 }
 0x49a   :  { %v679_v15 = vpop.f32.mrb[8].mxu1 }
 0x49b   :  { %v3847_v16 = vpop.f32.mrb[9].mxu1  ;;  %v686_v18 = vsel %vm197_vm2, %v679_v15, -inf }
 0x49c   :  { %687 = vmax.xlane.f32.xlu1 %v686_v18 }
 0x4ad   :  { %705 = vrot.lane.b32.xlu1 %v4564_v38, %s4365_s18 }
 0x4ae   :  { %781 = vrot.lane.b32.xlu0 %v4566_v39, %s4365_s18 }
 0x4b1   :  { %859 = vrot.lane.b32.xlu1 %v4532_v19, %s4366_s19 }
 0x4b5   :  { %937 = vrot.lane.b32.xlu1 %v4530_v17, %s4366_s19 }
 0x4b9   :  { %935 = vrot.lane.b32.xlu1 %v4551_v27, %s4367_s20 }
 0x525   :  { %v685_v21 = vpop.xlane.xlu0 %684 }
 0x526   :  { %v689_v22 = vsub.f32 %v601_v0, %v685_v21 }
 0x528   :  { %v691_v23 = vmul.f32 1.442695, %v689_v22 }
 0x529   :  { %v782_v24 = vpop.permute.xlu0 %781  ;;  %v688_v26 = vpop.xlane.xlu1 %687 }
 0x52a   :  { %4167 = vpow2.f32 %v691_v23  ;;  %v690_v28 = vsub.f32 %v679_v15, %v688_v26  ;;  %3854 = vmatpush3.msra.mxu1 %v782_v24 }
 0x52b   :  { %3863 = vmatprep.subr.mxu1 %v4359_v14 }
 0x52c   :  { %v693_v29 = vmul.f32 1.442695, %v690_v28 }
 0x52d   :  { %v706_v30 = vpop.permute.xlu1 %705 }
 0x52e   :  { %4169 = vpow2.f32 %v693_v29  ;;  %3849 = vmatpush3.msra.mxu0 %v706_v30 }
 0x52f   :  { %3858 = vmatprep.subr.mxu0 %v4359_v14 }
 0x531   :  { %v860_v40 = vpop.permute.xlu1 %859 }
 0x534   :  { %v4168_v31 = vpop.eup %4167 }
 0x535   :  { %v695_v32 = vsel %vm197_vm2, %v4168_v31, 0.0  ;;  %v938_v44 = vpop.permute.xlu1 %937 }
 0x536   :  { %696 = vadd.xlane.f32.xlu0 %v695_v32 }
 0x538   :  { %v4170_v33 = vpop.eup %4169 }
 0x539   :  { %v698_v35 = vsel %vm197_vm2, %v4170_v33, 0.0  ;;  %v936_v47 = vpop.permute.xlu1 %935 }
 0x53a   :  { %699 = vadd.xlane.f32.xlu0 %v698_v35 }
 0x550   :  { %857 = vrot.lane.b32.xlu0 %v4543_v25, %s4367_s20 }
 0x5c3   :  { %v697_v36 = vpop.xlane.xlu0 %696 }
 0x5c4   :  { %4171 = vrcp.f32 %v697_v36 }
 0x5c7   :  { %v700_v37 = vpop.xlane.xlu0 %699 }
 0x5c8   :  { %4173 = vrcp.f32 %v700_v37 }
 0x5cb   :  { %v858_v46 = vpop.permute.xlu0 %857 }
 0x5ce   :  { %v4172_v41 = vpop.eup %4171 }
 0x5cf   :  { %v703_v42 = vmul.f32 %v4172_v41, %v4168_v31 }
 0x5d1   :  { %3851 = vmatmul.mubr.msk.f32.vlgmr.msra.gmra.mrb[4].mxu0 %vm197_vm2, %v703_v42 }
 0x5d2   :  { %v4174_v43 = vpop.eup %4173  ;;  %3859 = vmatpush3.xpose.msk.msra.mxu0 %vm197_vm2, %v860_v40  ;;  %3860 = vmatprep.mubr.msk.f32.mxu0 %vm4360_vm1, %v4359_v14 }
 0x5d3   :  { %v704_v45 = vmul.f32 %v4174_v43, %v4170_v33  ;;  %3868 = vmatprep.subr.mxu0 %v4359_v14  ;;  %v4144_v43 = vpack.i.bf16 %v4503_v8, %v4494_v5 }
 0x5d5   :  { %3856 = vmatmul.mubr.msk.f32.vlgmr.msra.gmra.mrb[10].mxu1 %vm197_vm2, %v704_v45  ;;  %3861 = vmatmul.mubr.msk.f32.vlgmr.msra.gmra.mrb[6].mxu0 %vm197_vm2, %v858_v46 }
 0x5d6   :  { %3864 = vmatpush3.xpose.msk.msra.mxu1 %vm197_vm2, %v938_v44  ;;  %3865 = vmatprep.mubr.msk.f32.mxu1 %vm4360_vm1, %v4359_v14 }
 0x5d7   :  { %3873 = vmatprep.subr.mxu1 %v4359_v14  ;;  %3870 = vmatprep.mubr.msk.f32.mxu0 %vm4360_vm1, %v4359_v14 }
 0x5d9   :  { %3866 = vmatmul.mubr.msk.f32.vlgmr.msra.gmra.mrb[12].mxu1 %vm197_vm2, %v936_v47 }
 0x5da   :  { %3875 = vmatprep.mubr.msk.f32.mxu1 %vm4360_vm1, %v4359_v14 }
 0x6a4   :  { %v4634_v48 = vpop.f32.mrb[4].mxu0 }
 0x6a5   :  { %v3852_v49 = vpop.f32.mrb[5].mxu0 }
 0x6a8   :  { %v4636_v50 = vpop.f32.mrb[10].mxu1  ;;  %v931_v51 = vpop.f32.mrb[6].mxu0 }
 0x6a9   :  { %v3857_v52 = vpop.f32.mrb[11].mxu1  ;;  %v3862_v53 = vpop.f32.mrb[7].mxu0  ;;  %v1013_v54 = vsel %vm197_vm2, %v931_v51, -inf }
 0x6aa   :  { %1014 = vmax.xlane.f32.xlu0 %v1013_v54 }
 0x6ac   :  { %v1009_v55 = vpop.f32.mrb[12].mxu1 }
 0x6ad   :  { %v3867_v56 = vpop.f32.mrb[13].mxu1  ;;  %v1016_v57 = vsel %vm197_vm2, %v1009_v55, -inf }
 0x6ae   :  { %1017 = vmax.xlane.f32.xlu1 %v1016_v57 }
 0x6bf   :  { %1035 = vrot.lane.b32.xlu1 %v4564_v38, %s4368_s23 }
 0x6c0   :  { %1111 = vrot.lane.b32.xlu0 %v4566_v39, %s4368_s23 }
 0x6c3   :  { %1189 = vrot.lane.b32.xlu1 %v4532_v19, %s4369_s24 }
 0x6c7   :  { %1267 = vrot.lane.b32.xlu1 %v4530_v17, %s4369_s24 }
 0x6cb   :  { %1265 = vrot.lane.b32.xlu1 %v4551_v27, %s4370_s25 }
 0x737   :  { %v1015_v58 = vpop.xlane.xlu0 %1014 }
 0x738   :  { %v1019_v59 = vsub.f32 %v931_v51, %v1015_v58 }
 0x73a   :  { %v1021_v60 = vmul.f32 1.442695, %v1019_v59 }
 0x73b   :  { %v1112_v62 = vpop.permute.xlu0 %1111  ;;  %v1018_v0 = vpop.xlane.xlu1 %1017 }
 0x73c   :  { %4175 = vpow2.f32 %v1021_v60  ;;  %v1020_v7 = vsub.f32 %v1009_v55, %v1018_v0  ;;  %3874 = vmatpush3.msra.mxu1 %v1112_v62 }
 0x73d   :  { %3883 = vmatprep.subr.mxu1 %v4359_v14 }
 0x73e   :  { %v1023_v10 = vmul.f32 1.442695, %v1020_v7 }
 0x73f   :  { %v1036_v12 = vpop.permute.xlu1 %1035 }
 0x740   :  { %4177 = vpow2.f32 %v1023_v10  ;;  %3869 = vmatpush3.msra.mxu0 %v1036_v12 }
 0x741   :  { %3878 = vmatprep.subr.mxu0 %v4359_v14 }
 0x743   :  { %v1190_v21 = vpop.permute.xlu1 %1189 }
 0x746   :  { %v4176_v17 = vpop.eup %4175 }
 0x747   :  { %v1025_v19 = vsel %vm197_vm2, %v4176_v17, 0.0  ;;  %v1268_v26 = vpop.permute.xlu1 %1267 }
 0x748   :  { %1026 = vadd.xlane.f32.xlu0 %v1025_v19 }
 0x74a   :  { %v4178_v27 = vpop.eup %4177 }
 0x74b   :  { %v1028_v15 = vsel %vm197_vm2, %v4178_v27, 0.0  ;;  %v1266_v29 = vpop.permute.xlu1 %1265 }
 0x74c   :  { %1029 = vadd.xlane.f32.xlu0 %v1028_v15 }
 0x762   :  { %1187 = vrot.lane.b32.xlu0 %v4543_v25, %s4370_s25 }
 0x7d5   :  { %v1027_v16 = vpop.xlane.xlu0 %1026 }
 0x7d6   :  { %4179 = vrcp.f32 %v1027_v16 }
 0x7d9   :  { %v1030_v18 = vpop.xlane.xlu0 %1029 }
 0x7da   :  { %4181 = vrcp.f32 %v1030_v18 }
 0x7dd   :  { %v1188_v25 = vpop.permute.xlu0 %1187 }
 0x7e0   :  { %v4180_v22 = vpop.eup %4179 }
 0x7e1   :  { %v1033_v23 = vmul.f32 %v4180_v22, %v4176_v17 }
 0x7e3   :  { %3871 = vmatmul.mubr.msk.f32.vlgmr.msra.gmra.mrb[8].mxu0 %vm197_vm2, %v1033_v23 }
 0x7e4   :  { %v4182_v24 = vpop.eup %4181  ;;  %3879 = vmatpush3.xpose.msk.msra.mxu0 %vm197_vm2, %v1190_v21  ;;  %3880 = vmatprep.mubr.msk.f32.mxu0 %vm4360_vm1, %v4359_v14 }
 0x7e5   :  { %v1034_v28 = vmul.f32 %v4182_v24, %v4178_v27  ;;  %3888 = vmatprep.subr.mxu0 %v4359_v14 }
 0x7e7   :  { %3876 = vmatmul.mubr.msk.f32.vlgmr.msra.gmra.mrb[14].mxu1 %vm197_vm2, %v1034_v28  ;;  %3881 = vmatmul.mubr.msk.f32.vlgmr.msra.gmra.mrb[10].mxu0 %vm197_vm2, %v1188_v25 }
 0x7e8   :  { %3884 = vmatpush3.xpose.msk.msra.mxu1 %vm197_vm2, %v1268_v26  ;;  %3885 = vmatprep.mubr.msk.f32.mxu1 %vm4360_vm1, %v4359_v14 }
 0x7e9   :  { %3893 = vmatprep.subr.mxu1 %v4359_v14  ;;  %3890 = vmatprep.mubr.msk.f32.mxu0 %vm4360_vm1, %v4359_v14 }
 0x7eb   :  { %3886 = vmatmul.mubr.msk.f32.vlgmr.msra.gmra.mrb[16].mxu1 %vm197_vm2, %v1266_v29 }
 0x7ec   :  { %3895 = vmatprep.mubr.msk.f32.mxu1 %vm4360_vm1, %v4359_v14 }
 0x8b6   :  { %v1107_v30 = vpop.f32.mrb[8].mxu0 }
 0x8b7   :  { %v3872_v31 = vpop.f32.mrb[9].mxu0 }
 0x8ba   :  { %v1183_v32 = vpop.f32.mrb[14].mxu1  ;;  %v1261_v33 = vpop.f32.mrb[10].mxu0 }
 0x8bb   :  { %v3877_v35 = vpop.f32.mrb[15].mxu1  ;;  %v3882_v36 = vpop.f32.mrb[11].mxu0  ;;  %v1343_v37 = vsel %vm197_vm2, %v1261_v33, -inf }
 0x8bc   :  { %1344 = vmax.xlane.f32.xlu0 %v1343_v37 }
 0x8be   :  { %v1339_v40 = vpop.f32.mrb[16].mxu1 }
 0x8bf   :  { %v3887_v41 = vpop.f32.mrb[17].mxu1  ;;  %v1346_v42 = vsel %vm197_vm2, %v1339_v40, -inf }
 0x8c0   :  { %1347 = vmax.xlane.f32.xlu1 %v1346_v42 }
 0x8d1   :  { %1365 = vrot.lane.b32.xlu1 %v4564_v38, %s4371_s0 }
 0x8d5   :  { %4140 = vrot.lane.b32.xlu1 %v4139_v6, %s4358_s2 }
 0x8d9   :  { %4145 = vrot.lane.b32.xlu1 %v4144_v43, %s4358_s2 }
 0x8dd   :  { %1521 = vrot.lane.b32.xlu1 %v4636_v50, %s4356_s22 }
 0x8e1   :  { %1529 = vrot.lane.b32.xlu1 %v1183_v32, %s4372_s12 }
 0x949   :  { %v1345_v44 = vpop.xlane.xlu0 %1344 }
 0x94a   :  { %v1349_v45 = vsub.f32 %v1261_v33, %v1345_v44 }
 0x94c   :  { %v1351_v46 = vmul.f32 1.442695, %v1349_v45 }
 0x94d   :  { %v1348_v38 = vpop.xlane.xlu1 %1347 }
 0x94e   :  { %4183 = vpow2.f32 %v1351_v46  ;;  %v1350_v47 = vsub.f32 %v1339_v40, %v1348_v38 }
 0x950   :  { %v1353_v49 = vmul.f32 1.442695, %v1350_v47 }
 0x951   :  { %v1366_v3 = vpop.permute.xlu1 %1365 }
 0x952   :  { %4185 = vpow2.f32 %v1353_v49  ;;  %3889 = vmatpush3.msra.mxu0 %v1366_v3  ;;  %v1696_v49 = vld [vmem:[%s5055_s4 + $0x8] sm:$0xff] }
 0x955   :  { %v4141_v4 = vpop.permute.xlu1 %4140 }
 0x956   :  { %v4143_v5 = vunpack.i.h.bf16 %v4141_v4  ;;  %v4142_v6 = vunpack.i.l.bf16 %v4141_v4  ;;  %v4722_v4 = vld [vmem:[%s5054_s3] sm:$0xff] }
 0x958   :  { %v4184_v8 = vpop.eup %4183  ;;  %v4060_v51 = vpack.c.bf16 %v4143_v5, %v4142_v6  ;;  %v4727_v5 = vld [vmem:[%s5054_s3 + $0x8] sm:$0xff] }
 0x959   :  { %v1355_v50 = vsel %vm197_vm2, %v4184_v8, 0.0  ;;  %v4146_v56 = vpop.permute.xlu1 %4145  ;;  %v4068_v6 = vpack.c.bf16 %v4727_v5, %v4722_v4 }
 0x95a   :  { %1356 = vadd.xlane.f32.xlu0 %v1355_v50  ;;  %4061 = vmatprep.subr.bf16.mxu0 %v4060_v51  ;;  %v4148_v57 = vunpack.i.h.bf16 %v4146_v56  ;;  %v4147_v58 = vunpack.i.l.bf16 %v4146_v56  ;;  %v77_v56 = vld [vmem:[#allocation5 + $0x8] sm:$0xff] }
 0x95c   :  { %v4186_v52 = vpop.eup %4185  ;;  %v4064_v62 = vpack.c.bf16 %v4148_v57, %v4147_v58 }
 0x95d   :  { %v1358_v53 = vsel %vm197_vm2, %v4186_v52, 0.0  ;;  %v1522_v27 = vpop.permute.xlu1 %1521 }
 0x95e   :  { %1359 = vadd.xlane.f32.xlu0 %v1358_v53  ;;  %v1542_v24 = vsel %vm197_vm2, %v4600_v63, %v1522_v27  ;;  %v4745_v53 = vld [vmem:[%s5054_s3 + $0x18] sm:$0xff] }
 0x961   :  { %v1530_v18 = vpop.permute.xlu1 %1529 }
 0x962   :  { %v1545_v26 = vsel %vm1543_vm4, %v1542_v24, %v1530_v18 }
 0x974   :  { %1441 = vrot.lane.b32.xlu0 %v4566_v39, %s4371_s0 }
 0x978   :  { %1519 = vrot.lane.b32.xlu0 %v4634_v48, %s4356_s22 }
 0x97c   :  { %1527 = vrot.lane.b32.xlu0 %v1107_v30, %s4372_s12 }
 0x9e7   :  { %v1357_v54 = vpop.xlane.xlu0 %1356 }
 0x9e8   :  { %4187 = vrcp.f32 %v1357_v54 }
 0x9eb   :  { %v1360_v55 = vpop.xlane.xlu0 %1359 }
 0x9ec   :  { %4189 = vrcp.f32 %v1360_v55  ;;  %v76_v55 = vld [vmem:[#allocation5] sm:$0xff] }
 0x9ef   :  { %v1442_v59 = vpop.permute.xlu0 %1441 }
 0x9f0   :  { %3894 = vmatpush3.msra.mxu1 %v1442_v59 }
 0x9f1   :  { %4069 = vmatprep.subr.bf16.mxu1 %v4068_v6 }
 0x9f2   :  { %v4188_v60 = vpop.eup %4187 }
 0x9f3   :  { %v1363_v0 = vmul.f32 %v4188_v60, %v4184_v8  ;;  %v1520_v19 = vpop.permute.xlu0 %1519  ;;  %v1697_v8 = vld [vmem:[%s5055_s4 + $0x10] sm:$0xff] }
 0x9f4   :  { %v1541_v16 = vsel %vm197_vm2, %v4598_v61, %v1520_v19  ;;  %v1551_v61 = vsub.s32 3, %v4478_v1 }
 0x9f5   :  { %3891 = vmatmul.mubr.msk.f32.vlgmr.msra.gmra.mrb[12].mxu0 %vm197_vm2, %v1363_v0 }
 0x9f6   :  { %v4190_v39 = vpop.eup %4189  ;;  %4063 = vmatpush3.bf16.msra.mxu0 %v4060_v51  ;;  %v1552_v29 = vrot.slane %v4514_v11, %v1551_v61  ;;  %v1698_v51 = vld [vmem:[%s5055_s4 + $0x18] sm:$0xff] }
 0x9f7   :  { %v1364_v7 = vmul.f32 %v4190_v39, %v4186_v52  ;;  %4065 = vmatprep.subr.bf16.mxu0 %v4064_v62  ;;  %v1528_v15 = vpop.permute.xlu0 %1527  ;;  %v4080_v50 = vpack.c.bf16 %v1698_v51, %v1697_v8  ;;  %v4740_v52 = vld [vmem:[%s5054_s3 + $0x10] sm:$0xff]  ;;  %v1681_v39 = vsub.s32 4, %v4478_v1 }
 0x9f8   :  { %v1544_v21 = vsel %vm1543_vm4, %v1541_v16, %v1528_v15  ;;  %v4072_v54 = vpack.c.bf16 %v4745_v53, %v4740_v52 }
 0x9f9   :  { %3896 = vmatmul.mubr.msk.f32.vlgmr.msra.gmra.mrb[18].mxu1 %vm197_vm2, %v1364_v7  ;;  %v1687_v7 = vsub.s32 5, %v4478_v1 }
 0x9fa   :  { %4067 = vmatpush3.bf16.msra.mxu0 %v4064_v62  ;;  %4071 = vmatpush3.bf16.msra.mxu1 %v4068_v6 }
 0x9fb   :  { %4073 = vmatprep.subr.bf16.mxu1 %v4072_v54 }
 0x9fe   :  { %4075 = vmatpush3.bf16.msra.mxu1 %v4072_v54 }
 0x9ff   :  { %3931 = vmatprep.subr.mxu1 %v4359_v14 }
 0xac8   :  { %v1437_v48 = vpop.f32.mrb[12].mxu0 }
 0xac9   :  { %1535 = vrot.lane.b32.xlu0 %v1437_v48, %s4373_s26  ;;  %v3892_v10 = vpop.f32.mrb[13].mxu0  ;;  %v1682_v48 = vrot.slane %v4514_v11, %v1681_v39 }
 0xacc   :  { %v1513_v12 = vpop.f32.mrb[18].mxu1 }
 0xacd   :  { %1537 = vrot.lane.b32.xlu1 %v1513_v12, %s4373_s26  ;;  %v3897_v17 = vpop.f32.mrb[19].mxu1 }
 0xace   :  { %v1688_v17 = vrot.slane %v4514_v11, %v1687_v7 }
 0xb3b   :  { %v1536_v22 = vpop.permute.xlu0 %1535 }
 0xb3c   :  { %v1547_v23 = vsel %vm1546_vm3, %v1544_v21, %v1536_v22  ;;  %v1867_v22 = vsub.s32 7, %v4478_v1 }
 0xb3d   :  { %3906 = vmatprep.mubr.msk.f32.mxu0 %vm84_vm0, %v1547_v23 }
 0xb3e   :  { %v1868_v23 = vrot.slane %v4514_v11, %v1867_v22 }
 0xb3f   :  { %v1538_v28 = vpop.permute.xlu1 %1537 }
 0xb40   :  { %v1548_v25 = vsel %vm1546_vm3, %v1545_v26, %v1538_v28 }
 0xb41   :  { %3907 = vmatmul.mubr.msk.f32.vlgmr.msra.gmra.mrb[14].mxu0 %vm84_vm0, %v1548_v25 }
 0xb42   :  { %3928 = vmatprep.mubr.msk.f32.mxu0 %vm84_vm0, %v76_v55 }
 0xc14   :  { %v3908_v30 = vpop.f32.mrb[14].mxu0 }
 0xc15   :  { %v1647_v31 = vadd.f32 %v3908_v30, %v1552_v29  ;;  %v1641_v32 = vpop.f32.mrb[15].mxu0 }
 0xc16   :  { %v1642_v33 = vadd.f32 %v1641_v32, %v1552_v29  ;;  %v1701_v29 = vsub.s32 6, %v4478_v1 }
 0xc17   :  { %v1651_v35 = vadd.f32 %v1647_v31, %v4520_v13 }
 0xc18   :  { %v1650_v63 = vadd.f32 %v1642_v33, %v4505_v9  ;;  %v1695_v9 = vld [vmem:[%s5055_s4] sm:$0xff]  ;;  %v1702_v30 = vrot.slane %v4514_v11, %v1701_v29 }
 0xc19   :  { %v1655_v36 = vsel %vm84_vm0, %v1651_v35, 0.0  ;;  %v4076_v3 = vpack.c.bf16 %v1696_v49, %v1695_v9 }
 0xc1a   :  { %1656 = vadd.xlane.f32.xlu1 %v1655_v36  ;;  %v1652_v37 = vsel %vm84_vm0, %v1650_v63, 0.0 }
 0xc1b   :  { %1653 = vadd.xlane.f32.xlu0 %v1652_v37  ;;  %4077 = vmatprep.subr.bf16.mxu0 %v4076_v3 }
 0xc1c   :  { %4079 = vmatpush3.bf16.msra.mxu0 %v4076_v3 }
 0xc1d   :  { %4081 = vmatprep.subr.bf16.mxu0 %v4080_v50 }
 0xc20   :  { %4083 = vmatpush3.bf16.msra.mxu0 %v4080_v50 }
 0xc21   :  { %3941 = vmatprep.subr.mxu0 %v4359_v14 }
 0xc23   :  { %3929 = vmatmul.mubr.msk.f32.vlgmr.msra.gmra.mrb[16].mxu0 %vm84_vm0, %v77_v56 }
 0xc24   :  { %3943 = vmatprep.mubr.msk.f32.mxu0 %vm4360_vm1, %v4359_v14 }
 0xca7   :  { %v1657_v40 = vpop.xlane.xlu1 %1656 }
 0xca8   :  { %v1660_v41 = vmul.f32 0.03125, %v1657_v40  ;;  %v1654_v42 = vpop.xlane.xlu0 %1653 }
 0xca9   :  { %v1659_v43 = vmul.f32 0.03125, %v1654_v42 }
 0xcaa   :  { %v1662_v44 = vsub.f32 %v1651_v35, %v1660_v41 }
 0xcab   :  { %v1661_v45 = vsub.f32 %v1650_v63, %v1659_v43 }
 0xcac   :  { %v1664_v47 = vmul.f32 %v1662_v44, %v1662_v44 }
 0xcad   :  { %v1663_v46 = vmul.f32 %v1661_v45, %v1661_v45 }
 0xcae   :  { %v1668_v13 = vsel %vm84_vm0, %v1664_v47, 0.0 }
 0xcaf   :  { %v1665_v38 = vsel %vm84_vm0, %v1663_v46, 0.0 }
 0xcb0   :  { %1666 = vadd.xlane.f32.xlu0 %v1665_v38 }
 0xcb4   :  { %1669 = vadd.xlane.f32.xlu0 %v1668_v13 }
 0xcf6   :  { %v3930_v24 = vpop.f32.mrb[16].mxu0 }
 0xcf7   :  { %v4777_v26 = vadd.f32 %v3930_v24, %v1868_v23  ;;  %v1856_v28 = vpop.f32.mrb[17].mxu0 }
 0xcf8   :  { %v4779_v25 = vadd.f32 %v1868_v23, %v1856_v28 }
 0xd3d   :  { %v1667_v57 = vpop.xlane.xlu0 %1666 }
 0xd3e   :  { %v1671_v58 = vmul.f32 0.03125, %v1667_v57 }
 0xd40   :  { %v1673_v59 = vadd.f32 1e-05, %v1671_v58 }
 0xd41   :  { %v1670_v60 = vpop.xlane.xlu0 %1669 }
 0xd42   :  { %4191 = vrsqrt.f32 %v1673_v59  ;;  %v1672_v62 = vmul.f32 0.03125, %v1670_v60 }
 0xd44   :  { %v1674_v0 = vadd.f32 1e-05, %v1672_v62 }
 0xd46   :  { %4193 = vrsqrt.f32 %v1674_v0 }
 0xd4c   :  { %v4192_v10 = vpop.eup %4191 }
 0xd4d   :  { %v1677_v12 = vmul.f32 %v4192_v10, %v1661_v45 }
 0xd4f   :  { %v1683_v19 = vmul.f32 %v1682_v48, %v1677_v12 }
 0xd50   :  { %v4194_v27 = vpop.eup %4193 }
 0xd51   :  { %v1678_v15 = vmul.f32 %v4194_v27, %v1662_v44  ;;  %v4763_v16 = vadd.f32 %v1688_v17, %v1683_v19  ;;  %v4808_v44 = vld [vmem:[%s5058_s7 + $0x8] sm:$0xff] }
 0xd52   :  { %v1874_v45 = vrot.slane %v4808_v44, %v168_v20 }
 0xd53   :  { %v1684_v18 = vmul.f32 %v1682_v48, %v1678_v15  ;;  %3917 = vmatprep.mubr.msk.f32.mxu1 %vm84_vm0, %v4763_v16 }
 0xd55   :  { %v4767_v21 = vadd.f32 %v1688_v17, %v1684_v18 }
 0xd57   :  { %3918 = vmatmul.mubr.msk.f32.vlgmr.msra.gmra.mrb[20].mxu1 %vm84_vm0, %v4767_v21 }
 0xd58   :  { %3933 = vmatprep.mubr.msk.f32.mxu1 %vm4360_vm1, %v4359_v14  ;;  %3932 = vmatpush3.xpose.msk.msra.mxu1 %vm197_vm2, %v4779_v25 }
 0xd59   :  { %3936 = vmatprep.subr.mxu1 %v4359_v14 }
 0xe2a   :  { %v3919_v31 = vpop.f32.mrb[20].mxu1 }
 0xe2b   :  { %v1775_v32 = vpop.f32.mrb[21].mxu1  ;;  %v1781_v35 = vadd.f32 %v3919_v31, %v1702_v30 }
 0xe2c   :  { %v1776_v33 = vadd.f32 %v1775_v32, %v1702_v30 }
 0xe2d   :  { %v4796_v36 = vmul.f32 0.35355338, %v1781_v35 }
 0xe2e   :  { %v4788_v63 = vmul.f32 0.35355338, %v1776_v33 }
 0xe30   :  { %3934 = vmatmul.mubr.msk.f32.vlgmr.msra.gmra.mrb[22].mxu1 %vm197_vm2, %v4788_v63 }
 0xe31   :  { %3937 = vmatpush3.xpose.msk.msra.mxu1 %vm197_vm2, %v4777_v26  ;;  %3938 = vmatprep.mubr.msk.f32.mxu1 %vm4360_vm1, %v4359_v14 }
 0xe32   :  { %3946 = vmatprep.subr.mxu1 %v4359_v14 }
 0xe34   :  { %3939 = vmatmul.mubr.msk.f32.vlgmr.msra.gmra.mrb[24].mxu1 %vm197_vm2, %v4796_v36 }
 0xe35   :  { %3948 = vmatprep.mubr.msk.f32.mxu1 %vm4360_vm1, %v4359_v14 }
 0xf03   :  { %v1955_v11 = vpop.f32.mrb[22].mxu1 }
 0xf04   :  { %v3935_v37 = vpop.f32.mrb[23].mxu1  ;;  %v2035_v40 = vsel %vm197_vm2, %v1955_v11, -inf }
 0xf05   :  { %2036 = vmax.xlane.f32.xlu1 %v2035_v40 }
 0xf07   :  { %v2031_v41 = vpop.f32.mrb[24].mxu1 }
 0xf08   :  { %v3940_v42 = vpop.f32.mrb[25].mxu1  ;;  %v2038_v43 = vsel %vm197_vm2, %v2031_v41, -inf }
 0xf09   :  { %2039 = vmax.xlane.f32.xlu0 %v2038_v43 }
 0xf16   :  { %1876 = vrot.lane.b32.xlu1 %v1874_v45, %s4358_s2 }
 0xf92   :  { %v2037_v46 = vpop.xlane.xlu1 %2036 }
 0xf93   :  { %v2041_v20 = vsub.f32 %v1955_v11, %v2037_v46 }
 0xf95   :  { %v2043_v49 = vmul.f32 1.442695, %v2041_v20 }
 0xf96   :  { %v1877_v38 = vpop.permute.xlu1 %1876  ;;  %v2040_v9 = vpop.xlane.xlu0 %2039 }
 0xf97   :  { %v4814_v47 = vadd.f32 %v1877_v38, %v1856_v28  ;;  %v4816_v13 = vadd.f32 %v3930_v24, %v1877_v38  ;;  %v2042_v3 = vsub.f32 %v2031_v41, %v2040_v9  ;;  %4195 = vpow2.f32 %v2043_v49 }
 0xf99   :  { %2135 = vrot.lane.b32.xlu1 %v4816_v13, %s4361_s14  ;;  %2058 = vrot.lane.b32.xlu0 %v4814_v47, %s4361_s14  ;;  %v2045_v6 = vmul.f32 1.442695, %v2042_v3 }
 0xf9b   :  { %4197 = vpow2.f32 %v2045_v6 }
 0xf9d   :  { %2213 = vrot.lane.b32.xlu1 %v4779_v25, %s4364_s17 }
 0xfa1   :  { %2291 = vrot.lane.b32.xlu1 %v4777_v26, %s4364_s17  ;;  %v4196_v8 = vpop.eup %4195 }
 0xfa2   :  { %v2047_v51 = vsel %vm197_vm2, %v4196_v8, 0.0 }
 0xfa5   :  { %2211 = vrot.lane.b32.xlu1 %v4788_v63, %s4364_s17  ;;  %v4198_v50 = vpop.eup %4197 }
 0xfa6   :  { %v2050_v54 = vsel %vm197_vm2, %v4198_v50, 0.0 }
 0xfb8   :  { %2048 = vadd.xlane.f32.xlu0 %v2047_v51 }
 0xfbc   :  { %2051 = vadd.xlane.f32.xlu0 %v2050_v54 }
 0xfd2   :  { %2289 = vrot.lane.b32.xlu0 %v4796_v36, %s4364_s17 }
0x100b   :  { %v2136_v55 = vpop.permute.xlu1 %2135  ;;  %v2059_v56 = vpop.permute.xlu0 %2058 }
0x100c   :  { %3942 = vmatpush3.msra.mxu0 %v2059_v56  ;;  %3947 = vmatpush3.msra.mxu1 %v2136_v55 }
0x100d   :  { %3951 = vmatprep.subr.mxu0 %v4359_v14  ;;  %3956 = vmatprep.subr.mxu1 %v4359_v14 }
0x100f   :  { %v2214_v59 = vpop.permute.xlu1 %2213 }
0x1013   :  { %v2292_v62 = vpop.permute.xlu1 %2291 }
0x1017   :  { %v2212_v12 = vpop.permute.xlu1 %2211 }
0x1045   :  { %v2049_v57 = vpop.xlane.xlu0 %2048 }
0x1046   :  { %4199 = vrcp.f32 %v2049_v57 }
0x1049   :  { %v2052_v58 = vpop.xlane.xlu0 %2051 }
0x104a   :  { %4201 = vrcp.f32 %v2052_v58 }
0x104d   :  { %v2290_v17 = vpop.permute.xlu0 %2289 }
0x1050   :  { %v4200_v60 = vpop.eup %4199 }
0x1051   :  { %v2055_v0 = vmul.f32 %v4200_v60, %v4196_v8 }
0x1053   :  { %3944 = vmatmul.mubr.msk.f32.vlgmr.msra.gmra.mrb[18].mxu0 %vm197_vm2, %v2055_v0 }
0x1054   :  { %v4202_v48 = vpop.eup %4201  ;;  %3952 = vmatpush3.xpose.msk.msra.mxu0 %vm197_vm2, %v2214_v59  ;;  %3953 = vmatprep.mubr.msk.f32.mxu0 %vm4360_vm1, %v4359_v14 }
0x1055   :  { %v2056_v10 = vmul.f32 %v4202_v48, %v4198_v50  ;;  %3961 = vmatprep.subr.mxu0 %v4359_v14 }
0x1057   :  { %3949 = vmatmul.mubr.msk.f32.vlgmr.msra.gmra.mrb[26].mxu1 %vm197_vm2, %v2056_v10  ;;  %3954 = vmatmul.mubr.msk.f32.vlgmr.msra.gmra.mrb[20].mxu0 %vm197_vm2, %v2212_v12 }
0x1058   :  { %3957 = vmatpush3.xpose.msk.msra.mxu1 %vm197_vm2, %v2292_v62  ;;  %3958 = vmatprep.mubr.msk.f32.mxu1 %vm4360_vm1, %v4359_v14 }
0x1059   :  { %3966 = vmatprep.subr.mxu1 %v4359_v14  ;;  %3963 = vmatprep.mubr.msk.f32.mxu0 %vm4360_vm1, %v4359_v14 }
0x105b   :  { %3959 = vmatmul.mubr.msk.f32.vlgmr.msra.gmra.mrb[28].mxu1 %vm197_vm2, %v2290_v17 }
0x105c   :  { %3968 = vmatprep.mubr.msk.f32.mxu1 %vm4360_vm1, %v4359_v14 }
0x1126   :  { %v4850_v19 = vpop.f32.mrb[18].mxu0 }
0x1127   :  { %v3945_v27 = vpop.f32.mrb[19].mxu0 }
0x112a   :  { %v4852_v15 = vpop.f32.mrb[26].mxu1  ;;  %v2285_v18 = vpop.f32.mrb[20].mxu0 }
0x112b   :  { %v3950_v23 = vpop.f32.mrb[27].mxu1  ;;  %v3955_v24 = vpop.f32.mrb[21].mxu0  ;;  %v2367_v28 = vsel %vm197_vm2, %v2285_v18, -inf }
0x112c   :  { %2368 = vmax.xlane.f32.xlu1 %v2367_v28 }
0x112e   :  { %v2363_v30 = vpop.f32.mrb[28].mxu1 }
0x112f   :  { %v3960_v31 = vpop.f32.mrb[29].mxu1  ;;  %v2370_v32 = vsel %vm197_vm2, %v2363_v30, -inf }
0x1130   :  { %2371 = vmax.xlane.f32.xlu0 %v2370_v32 }
0x113d   :  { %2465 = vrot.lane.b32.xlu1 %v4816_v13, %s4363_s16 }
0x1141   :  { %2543 = vrot.lane.b32.xlu1 %v4779_v25, %s4367_s20 }
0x1146   :  { %2389 = vrot.lane.b32.xlu0 %v4814_v47, %s4363_s16 }
0x11b9   :  { %v2369_v33 = vpop.xlane.xlu1 %2368 }
0x11ba   :  { %v2373_v35 = vsub.f32 %v2285_v18, %v2369_v33 }
0x11bc   :  { %v2375_v11 = vmul.f32 1.442695, %v2373_v35 }
0x11bd   :  { %v2466_v37 = vpop.permute.xlu1 %2465  ;;  %v2372_v40 = vpop.xlane.xlu0 %2371 }
0x11be   :  { %4203 = vpow2.f32 %v2375_v11  ;;  %v2374_v41 = vsub.f32 %v2363_v30, %v2372_v40  ;;  %3967 = vmatpush3.msra.mxu1 %v2466_v37 }
0x11bf   :  { %3976 = vmatprep.subr.mxu1 %v4359_v14 }
0x11c0   :  { %v2377_v42 = vmul.f32 1.442695, %v2374_v41 }
0x11c1   :  { %v2390_v43 = vpop.permute.xlu0 %2389  ;;  %v2544_v9 = vpop.permute.xlu1 %2543 }
0x11c2   :  { %4205 = vpow2.f32 %v2377_v42  ;;  %3962 = vmatpush3.msra.mxu0 %v2390_v43 }
0x11c3   :  { %3971 = vmatprep.subr.mxu0 %v4359_v14 }
0x11c8   :  { %v4204_v45 = vpop.eup %4203 }
0x11c9   :  { %v2379_v46 = vsel %vm197_vm2, %v4204_v45, 0.0 }
0x11ca   :  { %2380 = vadd.xlane.f32.xlu0 %v2379_v46 }
0x11cc   :  { %v4206_v38 = vpop.eup %4205 }
0x11cd   :  { %v2382_v20 = vsel %vm197_vm2, %v4206_v38, 0.0 }
0x11ce   :  { %2383 = vadd.xlane.f32.xlu1 %v2382_v20 }
0x11df   :  { %2541 = vrot.lane.b32.xlu1 %v4788_v63, %s4367_s20 }
0x11e0   :  { %2621 = vrot.lane.b32.xlu0 %v4777_v26, %s4367_s20 }
0x11e4   :  { %2619 = vrot.lane.b32.xlu0 %v4796_v36, %s4367_s20 }
0x1257   :  { %v2381_v49 = vpop.xlane.xlu0 %2380 }
0x1258   :  { %4207 = vrcp.f32 %v2381_v49 }
0x125b   :  { %v2384_v3 = vpop.xlane.xlu1 %2383  ;;  %v2622_v50 = vpop.permute.xlu0 %2621 }
0x125c   :  { %4209 = vrcp.f32 %v2384_v3 }
0x125f   :  { %v2542_v55 = vpop.permute.xlu1 %2541  ;;  %v2620_v56 = vpop.permute.xlu0 %2619 }
0x1262   :  { %v4208_v6 = vpop.eup %4207 }
0x1263   :  { %v2387_v8 = vmul.f32 %v4208_v6, %v4204_v45 }
0x1265   :  { %3964 = vmatmul.mubr.msk.f32.vlgmr.msra.gmra.mrb[22].mxu0 %vm197_vm2, %v2387_v8 }
0x1266   :  { %v4210_v51 = vpop.eup %4209  ;;  %3972 = vmatpush3.xpose.msk.msra.mxu0 %vm197_vm2, %v2544_v9  ;;  %3973 = vmatprep.mubr.msk.f32.mxu0 %vm4360_vm1, %v4359_v14 }
0x1267   :  { %v2388_v54 = vmul.f32 %v4210_v51, %v4206_v38  ;;  %3981 = vmatprep.subr.mxu0 %v4359_v14 }
0x1269   :  { %3969 = vmatmul.mubr.msk.f32.vlgmr.msra.gmra.mrb[30].mxu1 %vm197_vm2, %v2388_v54  ;;  %3974 = vmatmul.mubr.msk.f32.vlgmr.msra.gmra.mrb[24].mxu0 %vm197_vm2, %v2542_v55 }
0x126a   :  { %3977 = vmatpush3.xpose.msk.msra.mxu1 %vm197_vm2, %v2622_v50  ;;  %3978 = vmatprep.mubr.msk.f32.mxu1 %vm4360_vm1, %v4359_v14 }
0x126b   :  { %3986 = vmatprep.subr.mxu1 %v4359_v14  ;;  %3983 = vmatprep.mubr.msk.f32.mxu0 %vm4360_vm1, %v4359_v14 }
0x126d   :  { %3979 = vmatmul.mubr.msk.f32.vlgmr.msra.gmra.mrb[32].mxu1 %vm197_vm2, %v2620_v56 }
0x126e   :  { %3988 = vmatprep.mubr.msk.f32.mxu1 %vm4360_vm1, %v4359_v14 }
0x1338   :  { %v4888_v57 = vpop.f32.mrb[22].mxu0 }
0x1339   :  { %v3965_v58 = vpop.f32.mrb[23].mxu0 }
0x133c   :  { %v4890_v59 = vpop.f32.mrb[30].mxu1  ;;  %v2615_v60 = vpop.f32.mrb[24].mxu0 }
0x133d   :  { %v3970_v62 = vpop.f32.mrb[31].mxu1  ;;  %v3975_v0 = vpop.f32.mrb[25].mxu0  ;;  %v2697_v48 = vsel %vm197_vm2, %v2615_v60, -inf }
0x133e   :  { %2698 = vmax.xlane.f32.xlu1 %v2697_v48 }
0x1340   :  { %v2693_v10 = vpop.f32.mrb[32].mxu1 }
0x1341   :  { %v3980_v12 = vpop.f32.mrb[33].mxu1  ;;  %v2700_v17 = vsel %vm197_vm2, %v2693_v10, -inf }
0x1342   :  { %2701 = vmax.xlane.f32.xlu0 %v2700_v17  ;;  %v4149_v17 = vpack.i.bf16 %v4727_v5, %v4722_v4 }
0x134f   :  { %2795 = vrot.lane.b32.xlu1 %v4816_v13, %s4366_s19 }
0x1353   :  { %2873 = vrot.lane.b32.xlu1 %v4779_v25, %s4370_s25 }
0x1358   :  { %2719 = vrot.lane.b32.xlu0 %v4814_v47, %s4366_s19 }
0x13cb   :  { %v2699_v27 = vpop.xlane.xlu1 %2698 }
0x13cc   :  { %v2703_v18 = vsub.f32 %v2615_v60, %v2699_v27  ;;  %v4154_v27 = vpack.i.bf16 %v4745_v53, %v4740_v52 }
0x13ce   :  { %v2705_v23 = vmul.f32 1.442695, %v2703_v18 }
0x13cf   :  { %v2796_v24 = vpop.permute.xlu1 %2795  ;;  %v2702_v28 = vpop.xlane.xlu0 %2701 }
0x13d0   :  { %4211 = vpow2.f32 %v2705_v23  ;;  %v2704_v30 = vsub.f32 %v2693_v10, %v2702_v28  ;;  %3987 = vmatpush3.msra.mxu1 %v2796_v24 }
0x13d1   :  { %3996 = vmatprep.subr.mxu1 %v4359_v14 }
0x13d2   :  { %v2707_v31 = vmul.f32 1.442695, %v2704_v30 }
0x13d3   :  { %v2720_v32 = vpop.permute.xlu0 %2719  ;;  %v2874_v37 = vpop.permute.xlu1 %2873 }
0x13d4   :  { %4213 = vpow2.f32 %v2707_v31  ;;  %3982 = vmatpush3.msra.mxu0 %v2720_v32 }
0x13d5   :  { %3991 = vmatprep.subr.mxu0 %v4359_v14 }
0x13da   :  { %v4212_v25 = vpop.eup %4211 }
0x13db   :  { %v2709_v33 = vsel %vm197_vm2, %v4212_v25, 0.0 }
0x13dc   :  { %2710 = vadd.xlane.f32.xlu0 %v2709_v33 }
0x13de   :  { %v4214_v35 = vpop.eup %4213 }
0x13df   :  { %v2712_v11 = vsel %vm197_vm2, %v4214_v35, 0.0 }
0x13e0   :  { %2713 = vadd.xlane.f32.xlu1 %v2712_v11 }
0x13f1   :  { %2871 = vrot.lane.b32.xlu1 %v4788_v63, %s4370_s25 }
0x13f2   :  { %2951 = vrot.lane.b32.xlu0 %v4777_v26, %s4370_s25 }
0x13f6   :  { %2949 = vrot.lane.b32.xlu0 %v4796_v36, %s4370_s25 }
0x1469   :  { %v2711_v40 = vpop.xlane.xlu0 %2710 }
0x146a   :  { %4215 = vrcp.f32 %v2711_v40 }
0x146d   :  { %v2714_v41 = vpop.xlane.xlu1 %2713  ;;  %v2952_v46 = vpop.permute.xlu0 %2951 }
0x146e   :  { %4217 = vrcp.f32 %v2714_v41 }
0x1471   :  { %v2872_v63 = vpop.permute.xlu1 %2871  ;;  %v2950_v36 = vpop.permute.xlu0 %2949 }
0x1474   :  { %v4216_v42 = vpop.eup %4215 }
0x1475   :  { %v2717_v43 = vmul.f32 %v4216_v42, %v4212_v25 }
0x1477   :  { %3984 = vmatmul.mubr.msk.f32.vlgmr.msra.gmra.mrb[26].mxu0 %vm197_vm2, %v2717_v43 }
0x1478   :  { %v4218_v45 = vpop.eup %4217  ;;  %3992 = vmatpush3.xpose.msk.msra.mxu0 %vm197_vm2, %v2874_v37  ;;  %3993 = vmatprep.mubr.msk.f32.mxu0 %vm4360_vm1, %v4359_v14 }
0x1479   :  { %v2718_v26 = vmul.f32 %v4218_v45, %v4214_v35  ;;  %4001 = vmatprep.subr.mxu0 %v4359_v14 }
0x147b   :  { %3989 = vmatmul.mubr.msk.f32.vlgmr.msra.gmra.mrb[34].mxu1 %vm197_vm2, %v2718_v26  ;;  %3994 = vmatmul.mubr.msk.f32.vlgmr.msra.gmra.mrb[28].mxu0 %vm197_vm2, %v2872_v63 }
0x147c   :  { %3997 = vmatpush3.xpose.msk.msra.mxu1 %vm197_vm2, %v2952_v46  ;;  %3998 = vmatprep.mubr.msk.f32.mxu1 %vm4360_vm1, %v4359_v14 }
0x147d   :  { %4006 = vmatprep.subr.mxu1 %v4359_v14  ;;  %4003 = vmatprep.mubr.msk.f32.mxu0 %vm4360_vm1, %v4359_v14 }
0x147f   :  { %3999 = vmatmul.mubr.msk.f32.vlgmr.msra.gmra.mrb[36].mxu1 %vm197_vm2, %v2950_v36 }
0x1480   :  { %4008 = vmatprep.mubr.msk.f32.mxu1 %vm4360_vm1, %v4359_v14 }
0x154a   :  { %v2791_v38 = vpop.f32.mrb[26].mxu0 }
0x154b   :  { %v3985_v20 = vpop.f32.mrb[27].mxu0 }
0x154e   :  { %v2867_v9 = vpop.f32.mrb[34].mxu1  ;;  %v2945_v49 = vpop.f32.mrb[28].mxu0 }
0x154f   :  { %v3990_v3 = vpop.f32.mrb[35].mxu1  ;;  %v3995_v6 = vpop.f32.mrb[29].mxu0  ;;  %v3027_v8 = vsel %vm197_vm2, %v2945_v49, -inf }
0x1550   :  { %3028 = vmax.xlane.f32.xlu1 %v3027_v8 }
0x1552   :  { %v3023_v51 = vpop.f32.mrb[36].mxu1 }
0x1553   :  { %v4000_v50 = vpop.f32.mrb[37].mxu1  ;;  %v3030_v54 = vsel %vm197_vm2, %v3023_v51, -inf }
0x1554   :  { %3031 = vmax.xlane.f32.xlu0 %v3030_v54 }
0x15dd   :  { %v3029_v55 = vpop.xlane.xlu1 %3028 }
0x15de   :  { %v3033_v56 = vsub.f32 %v2945_v49, %v3029_v55 }
0x15e0   :  { %v3035_v58 = vmul.f32 1.442695, %v3033_v56 }
0x15e1   :  { %v3032_v60 = vpop.xlane.xlu0 %3031 }
0x15e2   :  { %4219 = vpow2.f32 %v3035_v58  ;;  %v3034_v14 = vsub.f32 %v3023_v51, %v3032_v60 }
0x15e4   :  { %v3037_v62 = vmul.f32 1.442695, %v3034_v14 }
0x15e6   :  { %4221 = vpow2.f32 %v3037_v62 }
0x15ec   :  { %v4220_v0 = vpop.eup %4219 }
0x15ed   :  { %v3039_v48 = vsel %vm197_vm2, %v4220_v0, 0.0 }
0x15ee   :  { %3040 = vadd.xlane.f32.xlu0 %v3039_v48 }
0x15f0   :  { %v4222_v10 = vpop.eup %4221 }
0x15f1   :  { %v3042_v12 = vsel %vm197_vm2, %v4222_v10, 0.0 }
0x15f2   :  { %3043 = vadd.xlane.f32.xlu1 %v3042_v12 }
0x1603   :  { %3125 = vrot.lane.b32.xlu1 %v4816_v13, %s4369_s24 }
0x1604   :  { %3049 = vrot.lane.b32.xlu0 %v4814_v47, %s4369_s24 }
0x1607   :  { %4150 = vrot.lane.b32.xlu1 %v4149_v17, %s4361_s14  ;;  %v3374_v17 = vld [vmem:[#allocation7 + $0x10] sm:$0xff] }
0x1608   :  { %4155 = vrot.lane.b32.xlu0 %v4154_v27, %s4361_s14  ;;  %v3375_v27 = vld [vmem:[#allocation7 + $0x18] sm:$0xff] }
0x160b   :  { %3203 = vrot.lane.b32.xlu1 %v4888_v57, %s4356_s22 }
0x160c   :  { %3205 = vrot.lane.b32.xlu0 %v4890_v59, %s4356_s22 }
0x160f   :  { %3211 = vrot.lane.b32.xlu1 %v2791_v38, %s4372_s12 }
0x1610   :  { %3213 = vrot.lane.b32.xlu0 %v2867_v9, %s4372_s12 }
0x167b   :  { %v3041_v4 = vpop.xlane.xlu0 %3040 }
0x167c   :  { %4223 = vrcp.f32 %v3041_v4  ;;  %v4096_v4 = vpack.c.bf16 %v3375_v27, %v3374_v17 }
0x167f   :  { %v3044_v5 = vpop.xlane.xlu1 %3043  ;;  %v3050_v47 = vpop.permute.xlu0 %3049 }
0x1680   :  { %4225 = vrcp.f32 %v3044_v5  ;;  %4002 = vmatpush3.msra.mxu0 %v3050_v47  ;;  %v3463_v5 = vld [vmem:[%s5057_s6] sm:$0xff]  ;;  %v3464_v47 = vld [vmem:[%s5057_s6 + $0x8] sm:$0xff] }
0x1683   :  { %v3126_v52 = vpop.permute.xlu1 %3125  ;;  %v4156_v53 = vpop.permute.xlu0 %4155 }
0x1684   :  { %4007 = vmatpush3.msra.mxu1 %v3126_v52  ;;  %v4158_v18 = vunpack.i.h.bf16 %v4156_v53  ;;  %v4157_v23 = vunpack.i.l.bf16 %v4156_v53  ;;  %v3465_v52 = vld [vmem:[%s5057_s6 + $0x10] sm:$0xff]  ;;  %v4100_v53 = vpack.c.bf16 %v3464_v47, %v3463_v5 }
0x1686   :  { %v4224_v13 = vpop.eup %4223  ;;  %v4088_v31 = vpack.c.bf16 %v4158_v18, %v4157_v23  ;;  %v3467_v23 = vld [vmem:[%s5057_s6 + $0x20] sm:$0xff] }
0x1687   :  { %v3047_v57 = vmul.f32 %v4224_v13, %v4220_v0  ;;  %v4151_v24 = vpop.permute.xlu1 %4150  ;;  %v3206_v41 = vpop.permute.xlu0 %3205  ;;  %v3466_v13 = vld [vmem:[%s5057_s6 + $0x18] sm:$0xff] }
0x1688   :  { %v4153_v28 = vunpack.i.h.bf16 %v4151_v24  ;;  %v4152_v59 = vunpack.i.l.bf16 %v4151_v24  ;;  %v3226_v36 = vsel %vm197_vm2, %v4852_v15, %v3206_v41  ;;  %v4104_v18 = vpack.c.bf16 %v3466_v13, %v3465_v52 }
0x1689   :  { %4004 = vmatmul.mubr.msk.f32.vlgmr.msra.gmra.mrb[30].mxu0 %vm197_vm2, %v3047_v57  ;;  %v3468_v57 = vld [vmem:[%s5057_s6 + $0x28] sm:$0xff] }
0x168a   :  { %v4226_v30 = vpop.eup %4225  ;;  %v4084_v32 = vpack.c.bf16 %v4153_v28, %v4152_v59  ;;  %v4108_v24 = vpack.c.bf16 %v3468_v57, %v3467_v23 }
0x168b   :  { %v3048_v25 = vmul.f32 %v4226_v30, %v4222_v10  ;;  %v3204_v40 = vpop.permute.xlu1 %3203  ;;  %v3214_v45 = vpop.permute.xlu0 %3213  ;;  %v3373_v10 = vld [vmem:[#allocation7 + $0x8] sm:$0xff] }
0x168c   :  { %4085 = vmatprep.subr.bf16.mxu0 %v4084_v32  ;;  %v3225_v43 = vsel %vm197_vm2, %v4850_v19, %v3204_v40  ;;  %v3228_v38 = vsel %vm1543_vm4, %v3226_v36, %v3214_v45  ;;  %v3234_v19 = vrot.slane %v4808_v44, %v174_v2  ;;  %v3369_v40 = vrot.slane %v4808_v44, %v1551_v61 }
0x168d   :  { %4009 = vmatmul.mubr.msk.f32.vlgmr.msra.gmra.mrb[38].mxu1 %vm197_vm2, %v3048_v25  ;;  %4087 = vmatpush3.bf16.msra.mxu0 %v4084_v32  ;;  %v3379_v61 = vrot.slane %v4808_v44, %v1681_v39 }
0x168e   :  { %4089 = vmatprep.subr.bf16.mxu0 %v4088_v31 }
0x168f   :  { %v3212_v42 = vpop.permute.xlu1 %3211 }
0x1690   :  { %v3227_v46 = vsel %vm1543_vm4, %v3225_v43, %v3212_v42 }
0x1691   :  { %4091 = vmatpush3.bf16.msra.mxu0 %v4088_v31 }
0x1692   :  { %4101 = vmatprep.subr.bf16.mxu0 %v4100_v53 }
0x175c   :  { %v3121_v33 = vpop.f32.mrb[30].mxu0 }
0x175d   :  { %3219 = vrot.lane.b32.xlu1 %v3121_v33, %s4373_s26  ;;  %v4005_v35 = vpop.f32.mrb[31].mxu0  ;;  %v3363_v33 = vrot.slane %v4808_v44, %v184_v34  ;;  %v3469_v34 = vld [vmem:[%s5057_s6 + $0x30] sm:$0xff] }
0x1760   :  { %v3197_v11 = vpop.f32.mrb[38].mxu1 }
0x1761   :  { %3221 = vrot.lane.b32.xlu0 %v3197_v11, %s4373_s26  ;;  %v4010_v37 = vpop.f32.mrb[39].mxu1 }
0x17cf   :  { %v3220_v26 = vpop.permute.xlu1 %3219 }
0x17d0   :  { %v3229_v63 = vsel %vm1546_vm3, %v3227_v46, %v3220_v26  ;;  %v3470_v26 = vld [vmem:[%s5057_s6 + $0x38] sm:$0xff]  ;;  %s4374_s6 = smov [#allocation9]  }
0x17d1   :  { %3599 = vst.msk [vmem:[#allocation9] sm:$0xff] %vm84_vm0, %v3229_v63  ;;  %4019 = vmatprep.mubr.msk.f32.mxu0 %vm84_vm0, %v3229_v63  ;;  %v4112_v63 = vpack.c.bf16 %v3470_v26, %v3469_v34  ;;  %s3618_s10 = sshll.u32 %s4374_s6, 4  ;;  %s3619_s10 = int_to_ptr.vmem [resolvable:$true] %s3618_s10 }
0x17d2   :  { %s4301_s15 = scalar_lea.vmem %s3619_s10, 256  ;;  %p4306_p11 = scmp.lt.s32.totalorder %s3619_s10, %s3619_s10 }
0x17d3   :  { %v3222_v20 = vpop.permute.xlu0 %3221  ;;  %p4302_p10 = scmp.ne.s32.totalorder %s3619_s10, %s4301_s15  ;;  %p4307_p12 = scmp.lt.s32.totalorder %s4301_s15, %s4301_s15 }
0x17d4   :  { %v3230_v9 = vsel %vm1546_vm3, %v3228_v38, %v3222_v20 }
0x17d5   :  { %3600 = vst.msk [vmem:[#allocation9 + $0x8] sm:$0xff] %vm84_vm0, %v3230_v9  ;;  %4020 = vmatmul.mubr.msk.f32.vlgmr.msra.gmra.mrb[32].mxu0 %vm84_vm0, %v3230_v9  ;;  %p4308_p13 = por %p4307_p12, %p4306_p11 }
0x17d6   :  { %4103 = vmatpush3.bf16.msra.mxu0 %v4100_v53 }
0x17d7   :  { %4105 = vmatprep.subr.bf16.mxu0 %v4104_v18  ;;  %p4309_p0 = pnand %p4308_p13, %p4302_p10 }
0x17da   :  { %4107 = vmatpush3.bf16.msra.mxu0 %v4104_v18 }
0x17db   :  { %4109 = vmatprep.subr.bf16.mxu0 %v4108_v24 }
0x17de   :  { %4111 = vmatpush3.bf16.msra.mxu0 %v4108_v24 }
0x17df   :  { %4113 = vmatprep.subr.bf16.mxu0 %v4112_v63 }
0x17e2   :  { %4115 = vmatpush3.bf16.msra.mxu0 %v4112_v63 }
0x18a8   :  { %v4021_v49 = vpop.f32.mrb[32].mxu0 }
0x18a9   :  { %v3329_v3 = vadd.f32 %v4021_v49, %v3234_v19  ;;  %v3323_v6 = vpop.f32.mrb[33].mxu0 }
0x18aa   :  { %v3324_v8 = vadd.f32 %v3323_v6, %v3234_v19 }
0x18ab   :  { %v3333_v51 = vadd.f32 %v3329_v3, %v4767_v21  ;;  %v3474_v3 = vrot.slane %v4808_v44, %v1687_v7 }
0x18ac   :  { %v3332_v15 = vadd.f32 %v3324_v8, %v4763_v16  ;;  %v3372_v16 = vld [vmem:[#allocation7] sm:$0xff] }
0x18ad   :  { %v3337_v50 = vsel %vm84_vm0, %v3333_v51, 0.0  ;;  %v4092_v12 = vpack.c.bf16 %v3373_v10, %v3372_v16 }
0x18ae   :  { %3338 = vadd.xlane.f32.xlu0 %v3337_v50  ;;  %v3334_v54 = vsel %vm84_vm0, %v3332_v15, 0.0 }
0x18af   :  { %3335 = vadd.xlane.f32.xlu1 %v3334_v54  ;;  %4093 = vmatprep.subr.bf16.mxu1 %v4092_v12 }
0x18b0   :  { %4095 = vmatpush3.bf16.msra.mxu1 %v4092_v12 }
0x18b1   :  { %4097 = vmatprep.subr.bf16.mxu1 %v4096_v4 }
0x18b4   :  { %4099 = vmatpush3.bf16.msra.mxu1 %v4096_v4 }
0x193b   :  { %v3339_v55 = vpop.xlane.xlu0 %3338 }
0x193c   :  { %v3341_v56 = vmul.f32 0.03125, %v3339_v55  ;;  %v3336_v58 = vpop.xlane.xlu1 %3335 }
0x193d   :  { %v3340_v60 = vmul.f32 0.03125, %v3336_v58 }
0x193e   :  { %v3343_v14 = vsub.f32 %v3333_v51, %v3341_v56 }
0x193f   :  { %v3342_v2 = vsub.f32 %v3332_v15, %v3340_v60 }
0x1940   :  { %v3345_v62 = vmul.f32 %v3343_v14, %v3343_v14 }
0x1941   :  { %v3344_v0 = vmul.f32 %v3342_v2, %v3342_v2 }
0x1942   :  { %v3349_v48 = vsel %vm84_vm0, %v3345_v62, 0.0 }
0x1943   :  { %3350 = vadd.xlane.f32.xlu1 %v3349_v48  ;;  %v3346_v21 = vsel %vm84_vm0, %v3344_v0, 0.0 }
0x1944   :  { %3347 = vadd.xlane.f32.xlu0 %v3346_v21 }
0x19d0   :  { %v3351_v28 = vpop.xlane.xlu1 %3350 }
0x19d1   :  { %v3353_v59 = vmul.f32 0.03125, %v3351_v28  ;;  %v3348_v30 = vpop.xlane.xlu0 %3347 }
0x19d2   :  { %v3352_v31 = vmul.f32 0.03125, %v3348_v30 }
0x19d3   :  { %v3355_v32 = vadd.f32 1e-05, %v3353_v59 }
0x19d4   :  { %v3354_v25 = vadd.f32 1e-05, %v3352_v31 }
0x19d5   :  { %4227 = vrsqrt.f32 %v3355_v32 }
0x19d6   :  { %4229 = vrsqrt.f32 %v3354_v25 }
0x19df   :  { %v4228_v35 = vpop.eup %4227 }
0x19e0   :  { %v4230_v11 = vpop.eup %4229  ;;  %v3359_v37 = vmul.f32 %v4228_v35, %v3343_v14 }
0x19e1   :  { %v3358_v41 = vmul.f32 %v4230_v11, %v3342_v2 }
0x19e2   :  { %v3365_v42 = vmul.f32 %v3363_v33, %v3359_v37 }
0x19e3   :  { %v3364_v43 = vmul.f32 %v3363_v33, %v3358_v41 }
0x19e4   :  { %v3371_v46 = vadd.f32 %v3369_v40, %v3365_v42 }
0x19e5   :  { %v3370_v45 = vadd.f32 %v3369_v40, %v3364_v43 }
0x19e7   :  { %4030 = vmatprep.mubr.msk.f32.mxu1 %vm84_vm0, %v3370_v45 }
0x19e8   :  { %4031 = vmatmul.mubr.msk.f32.vlgmr.msra.gmra.mrb[40].mxu1 %vm84_vm0, %v3371_v46 }
0x1abb   :  { %v4032_v36 = vpop.f32.mrb[40].mxu1 }
0x1abc   :  { %v3458_v38 = vadd.f32 %v4032_v36, %v3379_v61  ;;  %v3452_v20 = vpop.f32.mrb[41].mxu1 }
0x1abd   :  { %v3453_v9 = vadd.f32 %v3452_v20, %v3379_v61 }
0x1abe   :  { %v3462_v49 = vmax.f32 %v3458_v38, 0.0 }
0x1abf   :  { %v3461_v19 = vmax.f32 %v3453_v9, 0.0 }
0x1ac1   :  { %4049 = vmatprep.mubr.msk.f32.mxu0 %vm3475_vm5, %v3461_v19 }
0x1ac2   :  { %4050 = vmatmul.mubr.msk.f32.vlgmr.msra.gmra.mrb[34].mxu0 %vm3475_vm5, %v3462_v49 }
0x1b95   :  { %v4051_v6 = vpop.f32.mrb[34].mxu0 }
0x1b96   :  { %v3554_v8 = vadd.f32 %v4051_v6, %v3474_v3  ;;  %v3548_v51 = vpop.f32.mrb[35].mxu0 }
0x1b97   :  { %v3549_v15 = vadd.f32 %v3548_v51, %v3474_v3 }
0x1b98   :  { %v3558_v50 = vadd.f32 %v3554_v8, %v3371_v46 }
0x1b99   :  { %v3557_v54 = vadd.f32 %v3549_v15, %v3370_v45 }
0x1b9a   :  { %v3562_v39 = vsel %vm84_vm0, %v3558_v50, 0.0 }
0x1b9b   :  { %3563 = vadd.xlane.f32.xlu1 %v3562_v39  ;;  %v3559_v55 = vsel %vm84_vm0, %v3557_v54, 0.0 }
0x1b9c   :  { %3560 = vadd.xlane.f32.xlu0 %v3559_v55 }
0x1c28   :  { %v3564_v56 = vpop.xlane.xlu1 %3563 }
0x1c29   :  { %v3566_v58 = vmul.f32 0.03125, %v3564_v56  ;;  %v3561_v60 = vpop.xlane.xlu0 %3560 }
0x1c2a   :  { %v3565_v14 = vmul.f32 0.03125, %v3561_v60 }
0x1c2b   :  { %v3568_v2 = vsub.f32 %v3558_v50, %v3566_v58 }
0x1c2c   :  { %v3567_v62 = vsub.f32 %v3557_v54, %v3565_v14 }
0x1c2d   :  { %v3570_v0 = vmul.f32 %v3568_v2, %v3568_v2 }
0x1c2e   :  { %v3569_v7 = vmul.f32 %v3567_v62, %v3567_v62 }
0x1c2f   :  { %v3574_v48 = vsel %vm84_vm0, %v3570_v0, 0.0 }
0x1c30   :  { %3575 = vadd.xlane.f32.xlu1 %v3574_v48  ;;  %v3571_v21 = vsel %vm84_vm0, %v3569_v7, 0.0 }
0x1c31   :  { %3572 = vadd.xlane.f32.xlu0 %v3571_v21 }
0x1c32   :  { %4312 = shalt.err (!%p4309_p0)
}
0x1c33   :  { %s4313_s0 = scalar_lea.hbm %s5060_s9, 256 }
0x1c34   :  { %p4314_p1 = scmp.ne.s32.totalorder %s5060_s9, %s4313_s0  ;;  %p4317_p2 = scmp.lt.u32.totalorder %s4313_s0, %s5060_s9 }
0x1c36   :  { %p4319_p3 = pnand %p4317_p2, %p4314_p1 }
0x1c38   :  { %4322 = shalt.err (!%p4319_p3)
}
0x1c39   :  { %3624 = dma.vmem_to_hbm [thread:$0]  %s3619_s10, 256, %s5060_s9, [#allocation10], %s4355_s21, %s4355_s21, %s4356_s22   ;;  %v3588_v5 = vrot.slane %v4808_v44, %v1701_v29  ;;  %v3594_v53 = vrot.slane %v4808_v44, %v1867_v22 }
0x1c3a   :  { %s4375_s9 = smov [#allocation8]  }
0x1c3b   :  { %s3606_s2 = sshll.u32 %s4375_s9, 4  ;;  %s3607_s2 = int_to_ptr.vmem [resolvable:$true] %s3606_s2 }
0x1c3c   :  { %s4323_s14 = scalar_lea.vmem %s3607_s2, 256  ;;  %p4328_p5 = scmp.lt.s32.totalorder %s3607_s2, %s3607_s2 }
0x1c3d   :  { %p4324_p4 = scmp.ne.s32.totalorder %s3607_s2, %s4323_s14  ;;  %p4329_p6 = scmp.lt.s32.totalorder %s4323_s14, %s4323_s14 }
0x1c3f   :  { %p4330_p7 = por %p4329_p6, %p4328_p5 }
0x1c41   :  { %p4331_p8 = pnand %p4330_p7, %p4324_p4 }
0x1cbd   :  { %v3576_v16 = vpop.xlane.xlu1 %3575 }
0x1cbe   :  { %v3578_v10 = vmul.f32 0.03125, %v3576_v16  ;;  %v3573_v12 = vpop.xlane.xlu0 %3572 }
0x1cbf   :  { %v3577_v17 = vmul.f32 0.03125, %v3573_v12 }
0x1cc0   :  { %v3580_v27 = vadd.f32 1e-05, %v3578_v10 }
0x1cc1   :  { %v3579_v4 = vadd.f32 1e-05, %v3577_v17 }
0x1cc2   :  { %4231 = vrsqrt.f32 %v3580_v27 }
0x1cc3   :  { %4233 = vrsqrt.f32 %v3579_v4 }
0x1ccc   :  { %v4232_v47 = vpop.eup %4231 }
0x1ccd   :  { %v4234_v52 = vpop.eup %4233  ;;  %v3584_v13 = vmul.f32 %v4232_v47, %v3568_v2 }
0x1cce   :  { %v3583_v18 = vmul.f32 %v4234_v52, %v3567_v62 }
0x1ccf   :  { %v3590_v23 = vmul.f32 %v3588_v5, %v3584_v13 }
0x1cd0   :  { %v3589_v57 = vmul.f32 %v3588_v5, %v3583_v18 }
0x1cd1   :  { %v3596_v24 = vadd.f32 %v3594_v53, %v3590_v23 }
0x1cd2   :  { %v3595_v28 = vadd.f32 %v3594_v53, %v3589_v57 }
0x1cd3   :  { %3598 = vst.msk [vmem:[#allocation8 + $0x8] sm:$0xff] %vm84_vm0, %v3596_v24 }
0x1cd4   :  { %3597 = vst.msk [vmem:[#allocation8] sm:$0xff] %vm84_vm0, %v3595_v28 }
0x1cd5   :  { %4334 = shalt.err (!%p4331_p8)
}
0x1cd6   :  { %s4335_s19 = scalar_lea.hbm %s5059_s8, 256 }
0x1cd7   :  { %p4336_p9 = scmp.ne.s32.totalorder %s5059_s8, %s4335_s19  ;;  %p4339_p10 = scmp.lt.u32.totalorder %s4335_s19, %s5059_s8 }
0x1cd9   :  { %p4341_p11 = pnand %p4339_p10, %p4336_p9 }
0x1cdb   :  { %4344 = shalt.err (!%p4341_p11)
}
0x1cdc   :  { %3612 = dma.vmem_to_hbm [thread:$0]  %s3607_s2, 256, %s5059_s8, [#allocation4], %s4355_s21, %s4355_s21, %s4356_s22  }
0x1cdd   :  { %4349 = dma.done.wait [#allocation4], 256  }
0x1cde   :  { %4350 = vsyncadd [#allocation4], 4294967040 }
0x1cdf   :  { %4351 = dma.done.wait [#allocation10], 256  }
0x1ce0   :  { %4352 = vsyncadd [#allocation10], 4294967040 }
0x1ce1   :  { %3631 = vsyncpa [#allocation3], 1 }
0x1ce2   :  { %3632 = vsyncpa [#allocation6], 1 }
0x1ce3   :  { %3633 = vsyncpa [#allocation4], 1 }
0x1ce4   :  { %3634 = vsyncpa [#allocation10], 1 }

</bundles_post_ra>
